<compile_context>
chip_gen: v7x
topology: tpu7x:2x2x1
jax: 0.10.0
libtpu: 0.0.40
codegen_flags: <defaults>
</compile_context>

<pallas_src>
import functools

import jax
import jax.numpy as jnp
from jax.experimental import pallas as pl
from jax.experimental.pallas import tpu as pltpu

_PARALLEL1 = pltpu.CompilerParams(dimension_semantics=("parallel",))


# ----------------------------------------------------------------------------
# Pallas kernels
# ----------------------------------------------------------------------------
def _matmul_bias_act_kernel(x_ref, w_ref, b_ref, o_ref, *, relu6):
    # (tm, K) @ (K, tn) on the MXU (bf16 operands, f32 accumulate) + bias (+ReLU6).
    acc = jnp.dot(x_ref[...], w_ref[...], preferred_element_type=jnp.float32)
    acc = acc + b_ref[...]
    if relu6:
        acc = jnp.clip(acc, 0.0, 6.0)
    o_ref[...] = acc.astype(o_ref.dtype)


def _stem_kernel(x_ref, w_ref, b_ref, o_ref):
    # 3x3 stride-2 conv on a phase-packed (space-to-depth) input.
    #   x_ref: (1, Ho+1, Wo+1, 4*Cin)  packed, zero-padded input
    #   w_ref: (4, 4*Cin, Cout)        one weight matrix per (di, dj) shift
    _, hop1, wop1, c4 = x_ref.shape
    ho, wo = hop1 - 1, wop1 - 1
    cout = o_ref.shape[3]
    x = x_ref[0]
    acc = jnp.zeros((ho * wo, cout), jnp.float32)
    for di in range(2):
        for dj in range(2):
            xs = x[di:di + ho, dj:dj + wo, :].reshape(ho * wo, c4)
            acc = acc + jnp.dot(xs, w_ref[di * 2 + dj],
                                preferred_element_type=jnp.float32)
    y = jnp.clip(acc + b_ref[...], 0.0, 6.0)
    o_ref[...] = y.reshape(1, ho, wo, cout).astype(o_ref.dtype)


def _fused_block_s1_kernel(*refs, expand, use_res):
    # Fused stride-1 inverted-residual block (one sample per grid step):
    #   expand 1x1 (MXU) -> ReLU6 -> depthwise 3x3 (VPU, f32) -> ReLU6
    #   -> project 1x1 (MXU) -> optional residual add.
    # The expanded hidden activation stays in the VMEM scratch `hidp_ref`
    # (zero-padded by 1 for the depthwise) and never goes to HBM.
    if expand:
        (x_ref, exp_w_ref, exp_b_ref, dw_w_ref, dw_b_ref,
         pw_ref, pb_ref, o_ref, hidp_ref) = refs
    else:
        (x_ref, dw_w_ref, dw_b_ref, pw_ref, pb_ref, o_ref, hidp_ref) = refs

    _, h, w, cin = x_ref.shape
    chid = dw_w_ref.shape[2]
    cout = o_ref.shape[3]

    x2d = x_ref[0].reshape(h * w, cin)
    if expand:
        hid = jnp.dot(x2d, exp_w_ref[...], preferred_element_type=jnp.float32)
        hid = jnp.clip(hid + exp_b_ref[...], 0.0, 6.0)
    else:
        hid = x2d.astype(jnp.float32)

    # Zero-padded hidden activation in VMEM scratch.
    hidp_ref[...] = jnp.zeros(hidp_ref.shape, jnp.float32)
    hidp_ref[1:h + 1, 1:w + 1, :] = hid.reshape(h, w, chid)
    hp = hidp_ref[...]

    dw_w = dw_w_ref[...]
    acc = jnp.zeros((h, w, chid), jnp.float32)
    for ki in range(3):
        for kj in range(3):
            acc = acc + hp[ki:ki + h, kj:kj + w, :] * dw_w[ki, kj].reshape(1, 1, chid)
    acc = jnp.clip(acc + dw_b_ref[...].reshape(1, 1, chid), 0.0, 6.0)

    y = jnp.dot(acc.reshape(h * w, chid).astype(jnp.bfloat16), pw_ref[...],
                preferred_element_type=jnp.float32)
    y = y + pb_ref[...]
    if use_res:
        y = y + x2d.astype(jnp.float32)
    o_ref[...] = y.reshape(1, h, w, cout).astype(o_ref.dtype)


def _dw3x3_s2_kernel(x00_ref, x01_ref, x10_ref, x11_ref, w_ref, b_ref, o_ref):
    # Depthwise 3x3, stride 2, pad 1 on a phase-split (space-to-depth) input.
    # Only the strided output positions are computed (no 4x over-compute).
    #   x{pi}{pj}_ref: (1, Ho+1, Wo+1, C) with x[pi][pj][a,b,c] = xpad[2a+pi, 2b+pj, c]
    _, hop1, wop1, c = x00_ref.shape
    ho, wo = hop1 - 1, wop1 - 1
    xs = [r[0].astype(jnp.float32) for r in (x00_ref, x01_ref, x10_ref, x11_ref)]
    w = w_ref[...]
    acc = jnp.zeros((ho, wo, c), jnp.float32)
    for ki in range(3):
        di, pi = divmod(ki, 2)
        for kj in range(3):
            dj, pj = divmod(kj, 2)
            xph = xs[pi * 2 + pj]
            acc = acc + xph[di:di + ho, dj:dj + wo, :] * w[ki, kj].reshape(1, 1, c)
    acc = jnp.clip(acc + b_ref[...].reshape(1, 1, c), 0.0, 6.0)
    o_ref[...] = acc.reshape(1, ho, wo, c).astype(o_ref.dtype)


def _head_gap_fc_kernel(x_ref, hw_ref, hb_ref, fw_ref, fb_ref, o_ref):
    # head 1x1 conv (320->1280) + ReLU6 + global-avg-pool + Linear(1280, 1).
    _, h, w, cin = x_ref.shape
    x2d = x_ref[0].reshape(h * w, cin)
    y = jnp.dot(x2d, hw_ref[...], preferred_element_type=jnp.float32) + hb_ref[...]
    y = jnp.clip(y, 0.0, 6.0)
    pooled = jnp.sum(y, axis=0, keepdims=True) * (1.0 / float(h * w))      # (1, 1280)
    out = jnp.sum(pooled * fw_ref[...], axis=1, keepdims=True) + fb_ref[...]  # (1, 1)
    o_ref[...] = out.reshape(1, 1, 1).astype(o_ref.dtype)


# ----------------------------------------------------------------------------
# Glue: space-to-depth packing for stride-2 3x3 convs (pure data movement)
# ----------------------------------------------------------------------------
def _pad_space_to_depth(x):
    # (N,H,W,C) -> (N,Ho+1,Wo+1,4C), packed channel = (pi*2+pj)*C + c,
    # zero-padded for a 3x3 / stride-2 / pad-1 conv.
    n, h, w, c = x.shape
    ho, wo = (h - 1) // 2 + 1, (w - 1) // 2 + 1
    xp = jnp.pad(x, ((0, 0), (1, 2 * ho + 1 - h), (1, 2 * wo + 1 - w), (0, 0)))
    xp = xp.reshape(n, ho + 1, 2, wo + 1, 2, c)
    xp = jnp.transpose(xp, (0, 1, 3, 2, 4, 5)).reshape(n, ho + 1, wo + 1, 4 * c)
    return xp, ho, wo


def _pad_phase_split(x):
    # Same as above but returns 4 separate phase arrays (pi, pj) of shape
    # (N, Ho+1, Wo+1, C) so the kernel never slices the lane dimension.
    n, h, w, c = x.shape
    ho, wo = (h - 1) // 2 + 1, (w - 1) // 2 + 1
    xp = jnp.pad(x, ((0, 0), (1, 2 * ho + 1 - h), (1, 2 * wo + 1 - w), (0, 0)))
    xp = xp.reshape(n, ho + 1, 2, wo + 1, 2, c)
    phases = [xp[:, :, pi, :, pj, :] for pi in range(2) for pj in range(2)]
    return phases, ho, wo


# ----------------------------------------------------------------------------
# pallas_call wrappers
# ----------------------------------------------------------------------------
def _pick_tile(dim, prefs):
    for p in prefs:
        if dim % p == 0:
            return p
    return dim


def matmul_bias_act(x, w, b, relu6):
    # Gridded (M,K)@(K,N) + bias (+ReLU6); M/N tiles are double-buffered by
    # BlockSpec pipelining, both grid axes are "parallel" (megacore on v7x).
    m, k = x.shape
    n = w.shape[1]
    tm = _pick_tile(m, (256, 128, 64, 32, 16, 8))
    tn = _pick_tile(n, (256, 128))
    kern = functools.partial(_matmul_bias_act_kernel, relu6=relu6)
    return pl.pallas_call(
        kern,
        out_shape=jax.ShapeDtypeStruct((m, n), jnp.bfloat16),
        grid=(m // tm, n // tn),
        in_specs=[pl.BlockSpec((tm, k), lambda i, j: (i, 0)),
                  pl.BlockSpec((k, tn), lambda i, j: (0, j)),
                  pl.BlockSpec((1, tn), lambda i, j: (0, j))],
        out_specs=pl.BlockSpec((tm, tn), lambda i, j: (i, j)),
        compiler_params=pltpu.CompilerParams(
            dimension_semantics=("parallel", "parallel")),
    )(x, w, b)


def stem_conv(x, w4, b):
    n, _, _, cin = x.shape
    cout = w4.shape[-1]
    xs, ho, wo = _pad_space_to_depth(x)
    return pl.pallas_call(
        _stem_kernel,
        out_shape=jax.ShapeDtypeStruct((n, ho, wo, cout), x.dtype),
        grid=(n,),
        in_specs=[pl.BlockSpec((1, ho + 1, wo + 1, 4 * cin), lambda bb: (bb, 0, 0, 0)),
                  pl.BlockSpec(w4.shape, lambda bb: (0, 0, 0)),
                  pl.BlockSpec(b.shape, lambda bb: (0, 0))],
        out_specs=pl.BlockSpec((1, ho, wo, cout), lambda bb: (bb, 0, 0, 0)),
        compiler_params=_PARALLEL1,
    )(xs, w4, b)


def fused_block_s1(x, blk):
    n, h, w, cin = x.shape
    chid = blk["dw_w"].shape[2]
    cout = blk["proj_w"].shape[1]
    expand, use_res = blk["expand"], blk["use_res"]

    kern = functools.partial(_fused_block_s1_kernel, expand=expand, use_res=use_res)
    args = [x]
    in_specs = [pl.BlockSpec((1, h, w, cin), lambda b: (b, 0, 0, 0))]
    if expand:
        args += [blk["exp_w"], blk["exp_b"]]
        in_specs += [pl.BlockSpec(blk["exp_w"].shape, lambda b: (0, 0)),
                     pl.BlockSpec(blk["exp_b"].shape, lambda b: (0, 0))]
    args += [blk["dw_w"], blk["dw_b"], blk["proj_w"], blk["proj_b"]]
    in_specs += [pl.BlockSpec(blk["dw_w"].shape, lambda b: (0, 0, 0)),
                 pl.BlockSpec(blk["dw_b"].shape, lambda b: (0, 0)),
                 pl.BlockSpec(blk["proj_w"].shape, lambda b: (0, 0)),
                 pl.BlockSpec(blk["proj_b"].shape, lambda b: (0, 0))]

    return pl.pallas_call(
        kern,
        out_shape=jax.ShapeDtypeStruct((n, h, w, cout), x.dtype),
        grid=(n,),
        in_specs=in_specs,
        out_specs=pl.BlockSpec((1, h, w, cout), lambda b: (b, 0, 0, 0)),
        scratch_shapes=[pltpu.VMEM((h + 2, w + 2, chid), jnp.float32)],
        compiler_params=_PARALLEL1,
    )(*args)


def block_s2(x, blk):
    n, h, w, cin = x.shape
    chid = blk["dw_w"].shape[2]
    cout = blk["proj_w"].shape[1]

    # expand 1x1 (gridded MXU matmul + ReLU6)
    if blk["expand"]:
        hid = matmul_bias_act(x.reshape(n * h * w, cin), blk["exp_w"],
                              blk["exp_b"], relu6=True)
        hid = hid.reshape(n, h, w, chid)
    else:
        hid = x

    # depthwise 3x3 stride 2: compute only the strided output positions
    phases, ho, wo = _pad_phase_split(hid)
    dw = pl.pallas_call(
        _dw3x3_s2_kernel,
        out_shape=jax.ShapeDtypeStruct((n, ho, wo, chid), x.dtype),
        grid=(n,),
        in_specs=[pl.BlockSpec((1, ho + 1, wo + 1, chid), lambda b: (b, 0, 0, 0))] * 4
                 + [pl.BlockSpec(blk["dw_w"].shape, lambda b: (0, 0, 0)),
                    pl.BlockSpec(blk["dw_b"].shape, lambda b: (0, 0))],
        out_specs=pl.BlockSpec((1, ho, wo, chid), lambda b: (b, 0, 0, 0)),
        compiler_params=_PARALLEL1,
    )(*phases, blk["dw_w"], blk["dw_b"])

    # project 1x1 (gridded MXU matmul, linear activation)
    y = matmul_bias_act(dw.reshape(n * ho * wo, chid), blk["proj_w"],
                        blk["proj_b"], relu6=False)
    return y.reshape(n, ho, wo, cout)


def head_gap_fc(x, hw, hb, fw, fb):
    n, h, w, cin = x.shape
    out = pl.pallas_call(
        _head_gap_fc_kernel,
        out_shape=jax.ShapeDtypeStruct((n, 1, 1), jnp.float32),
        grid=(n,),
        in_specs=[pl.BlockSpec((1, h, w, cin), lambda b: (b, 0, 0, 0)),
                  pl.BlockSpec(hw.shape, lambda b: (0, 0)),
                  pl.BlockSpec(hb.shape, lambda b: (0, 0)),
                  pl.BlockSpec(fw.shape, lambda b: (0, 0)),
                  pl.BlockSpec(fb.shape, lambda b: (0, 0))],
        out_specs=pl.BlockSpec((1, 1, 1), lambda b: (b, 0, 0)),
        compiler_params=_PARALLEL1,
    )(x, hw, hb, fw, fb)
    return out.reshape(n, 1)


# ----------------------------------------------------------------------------
# Parameter construction (deterministic synthetic weights; BN scale folded
# into the conv weights, only the bias remains for the kernels)
# ----------------------------------------------------------------------------
_INVERTED_RESIDUAL_SETTING = [  # t, c, n, s  (torchvision MobileNetV2, width=1.0)
    (1, 16, 1, 1),
    (6, 24, 2, 2),
    (6, 32, 3, 2),
    (6, 64, 4, 2),
    (6, 96, 3, 1),
    (6, 160, 3, 2),
    (6, 320, 1, 1),
]


def _fold_bn(gamma, beta, mean, var, eps=1e-5):
    scale = gamma / jnp.sqrt(var + eps)
    bias = beta - mean * scale
    return scale, bias


def _init_bn(key, c):
    k1, k2, k3, k4 = jax.random.split(key, 4)
    gamma = 1.0 + 0.1 * jax.random.normal(k1, (c,), jnp.float32)
    beta = 0.1 * jax.random.normal(k2, (c,), jnp.float32)
    mean = 0.1 * jax.random.normal(k3, (c,), jnp.float32)
    var = 1.0 + 0.1 * jnp.abs(jax.random.normal(k4, (c,), jnp.float32))
    return _fold_bn(gamma, beta, mean, var)


def _init_conv(key, shape, fan_in):
    return jax.random.normal(key, shape, jnp.float32) / jnp.sqrt(float(fan_in))


def _stem_weight_s2d(w):
    # (3,3,Cin,Cout) -> (4, 4*Cin, Cout): one weight matrix per (di,dj) shift of
    # the phase-packed input; missing taps (ki==3 or kj==3) are zero.
    cin, cout = w.shape[2], w.shape[3]
    w4 = jnp.zeros((4, 4 * cin, cout), jnp.float32)
    for di in range(2):
        for dj in range(2):
            for pi in range(2):
                for pj in range(2):
                    ki, kj = 2 * di + pi, 2 * dj + pj
                    if ki < 3 and kj < 3:
                        ph = (pi * 2 + pj) * cin
                        w4 = w4.at[di * 2 + dj, ph:ph + cin, :].set(w[ki, kj])
    return w4


def init_params(key):
    keys = iter(jax.random.split(key, 256))
    params = {}

    # Stem: ConvBNReLU(3, 32, kernel=3, stride=2)
    w = _init_conv(next(keys), (3, 3, 3, 32), 27)
    scale, bias = _init_bn(next(keys), 32)
    params["stem_w"] = _stem_weight_s2d(w * scale).astype(jnp.bfloat16)
    params["stem_b"] = bias.reshape(1, 32)

    blocks = []
    inp = 32
    for t, c, n, s in _INVERTED_RESIDUAL_SETTING:
        for i in range(n):
            stride = s if i == 0 else 1
            hidden = inp * t
            blk = {"stride": stride,
                   "use_res": (stride == 1 and inp == c),
                   "expand": (t != 1)}
            if t != 1:
                ew = _init_conv(next(keys), (inp, hidden), inp)
                es, eb = _init_bn(next(keys), hidden)
                blk["exp_w"] = (ew * es).astype(jnp.bfloat16)
                blk["exp_b"] = eb.reshape(1, hidden)
            dw = _init_conv(next(keys), (3, 3, hidden), 9)
            dsc, db = _init_bn(next(keys), hidden)
            blk["dw_w"] = dw * dsc                      # f32 (VPU math)
            blk["dw_b"] = db.reshape(1, hidden)
            pw = _init_conv(next(keys), (hidden, c), hidden)
            psc, pb = _init_bn(next(keys), c)
            blk["proj_w"] = (pw * psc).astype(jnp.bfloat16)
            blk["proj_b"] = pb.reshape(1, c)
            blocks.append(blk)
            inp = c
    params["blocks"] = blocks

    # Head: ConvBNReLU(320, 1280, kernel=1)
    hw = _init_conv(next(keys), (320, 1280), 320)
    hs, hb = _init_bn(next(keys), 1280)
    params["head_w"] = (hw * hs).astype(jnp.bfloat16)
    params["head_b"] = hb.reshape(1, 1280)

    # Classifier: Dropout(0.2) [identity at inference] + Linear(1280, 1)
    params["fc_w"] = _init_conv(next(keys), (1, 1280), 1280)   # f32, like nn.Linear
    params["fc_b"] = 0.01 * jax.random.normal(next(keys), (1, 1), jnp.float32)
    return params


# ----------------------------------------------------------------------------
# Forward pass (matches SurvivalPatchCNN.forward, inference semantics)
# ----------------------------------------------------------------------------
def forward(params, x_nchw):
    # x: (N, 3, H, W) float32, PyTorch NCHW convention.
    x = jnp.transpose(x_nchw, (0, 2, 3, 1)).astype(jnp.bfloat16)   # NHWC, bf16 MXU operands

    # features[0]: stem conv
    x = stem_conv(x, params["stem_w"], params["stem_b"])

    # features[1:18]: inverted-residual blocks
    for blk in params["blocks"]:
        if blk["stride"] == 1:
            x = fused_block_s1(x, blk)      # fully fused (expand/dw/project/residual)
        else:
            x = block_s2(x, blk)            # strided depthwise, no over-compute

    # features[18] + mean([2,3]) + classifier, fused into one kernel
    return head_gap_fc(x, params["head_w"], params["head_b"],
                       params["fc_w"], params["fc_b"])


if __name__ == "__main__":
    key = jax.random.PRNGKey(0)
    kp, kx = jax.random.split(key)
    params = init_params(kp)
    # Small MobileNet-compatible input: batch=2, 3 channels, 32x32 spatial (NCHW).
    x = jax.random.normal(kx, (2, 3, 32, 32), jnp.float32)
    out = forward(params, x)
    out = jax.block_until_ready(out)
    assert out.shape == (2, 1) and out.dtype == jnp.float32
    print("KERNEL_OK")
</pallas_src>

<mosaic_0001>
module attributes {stable_mosaic.version = 11 : i64} {
  func.func @_stem_kernel(%arg0: i32, %arg1: memref<1x17x17x12xbf16, #tpu.memory_space<vmem>>, %arg2: memref<4x12x32xbf16, #tpu.memory_space<vmem>>, %arg3: memref<1x32xf32, #tpu.memory_space<vmem>>, %arg4: memref<1x16x16x32xbf16, #tpu.memory_space<vmem>>) attributes {dimension_semantics = [#tpu.dimension_semantics<parallel>], iteration_bounds = array<i64: 2>, scalar_prefetch = 0 : i64, scratch_operands = 0 : i64, tpu.core_type = #tpu.core_type<tc>, window_params = [{transform_indices = @transform_0, window_bounds = array<i64: 1, 17, 17, 12>}, {pipeline_mode = #tpu.pipeline_mode<synchronous>, transform_indices = @transform_1, window_bounds = array<i64: 4, 12, 32>}, {pipeline_mode = #tpu.pipeline_mode<synchronous>, transform_indices = @transform_2, window_bounds = array<i64: 1, 32>}, {transform_indices = @transform_3, window_bounds = array<i64: 1, 16, 16, 32>}]} {
    %c0 = arith.constant 0 : index
    %c0_0 = arith.constant 0 : index
    %c0_1 = arith.constant 0 : index
    %c0_2 = arith.constant 0 : index
    %0 = vector.load %arg1[%c0, %c0_0, %c0_1, %c0_2] : memref<1x17x17x12xbf16, #tpu.memory_space<vmem>>, vector<1x17x17x12xbf16>
    %1 = vector.shape_cast %0 : vector<1x17x17x12xbf16> to vector<17x17x12xbf16>
    %cst = arith.constant 0.000000e+00 : f32
    %2 = vector.broadcast %cst : f32 to vector<256x32xf32>
    %3 = vector.extract_strided_slice %1 {offsets = [0, 0, 0], sizes = [16, 16, 12], strides = [1, 1, 1]} : vector<17x17x12xbf16> to vector<16x16x12xbf16>
    %4 = vector.shape_cast %3 : vector<16x16x12xbf16> to vector<256x12xbf16>
    %c0_3 = arith.constant 0 : index
    %c0_4 = arith.constant 0 : index
    %c0_5 = arith.constant 0 : index
    %5 = vector.load %arg2[%c0_3, %c0_4, %c0_5] : memref<4x12x32xbf16, #tpu.memory_space<vmem>>, vector<1x12x32xbf16>
    %6 = vector.shape_cast %5 : vector<1x12x32xbf16> to vector<12x32xbf16>
    %cst_6 = arith.constant dense<0.000000e+00> : vector<256x32xf32>
    %7 = tpu.matmul %4, %6, %cst_6 {dimension_numbers = #tpu.dot_dimension_numbers<[1], [0], [0], [1], [0, 0, 1, 1], [], []>} : vector<256x12xbf16>, vector<12x32xbf16>, vector<256x32xf32> -> vector<256x32xf32>
    %8 = arith.addf %2, %7 : vector<256x32xf32>
    %9 = vector.extract_strided_slice %1 {offsets = [0, 1, 0], sizes = [16, 16, 12], strides = [1, 1, 1]} : vector<17x17x12xbf16> to vector<16x16x12xbf16>
    %10 = vector.shape_cast %9 : vector<16x16x12xbf16> to vector<256x12xbf16>
    %c1 = arith.constant 1 : index
    %c0_7 = arith.constant 0 : index
    %c0_8 = arith.constant 0 : index
    %11 = vector.load %arg2[%c1, %c0_7, %c0_8] : memref<4x12x32xbf16, #tpu.memory_space<vmem>>, vector<1x12x32xbf16>
    %12 = vector.shape_cast %11 : vector<1x12x32xbf16> to vector<12x32xbf16>
    %cst_9 = arith.constant dense<0.000000e+00> : vector<256x32xf32>
    %13 = tpu.matmul %10, %12, %cst_9 {dimension_numbers = #tpu.dot_dimension_numbers<[1], [0], [0], [1], [0, 0, 1, 1], [], []>} : vector<256x12xbf16>, vector<12x32xbf16>, vector<256x32xf32> -> vector<256x32xf32>
    %14 = arith.addf %8, %13 : vector<256x32xf32>
    %15 = vector.extract_strided_slice %1 {offsets = [1, 0, 0], sizes = [16, 16, 12], strides = [1, 1, 1]} : vector<17x17x12xbf16> to vector<16x16x12xbf16>
    %16 = vector.shape_cast %15 : vector<16x16x12xbf16> to vector<256x12xbf16>
    %c2 = arith.constant 2 : index
    %c0_10 = arith.constant 0 : index
    %c0_11 = arith.constant 0 : index
    %17 = vector.load %arg2[%c2, %c0_10, %c0_11] : memref<4x12x32xbf16, #tpu.memory_space<vmem>>, vector<1x12x32xbf16>
    %18 = vector.shape_cast %17 : vector<1x12x32xbf16> to vector<12x32xbf16>
    %cst_12 = arith.constant dense<0.000000e+00> : vector<256x32xf32>
    %19 = tpu.matmul %16, %18, %cst_12 {dimension_numbers = #tpu.dot_dimension_numbers<[1], [0], [0], [1], [0, 0, 1, 1], [], []>} : vector<256x12xbf16>, vector<12x32xbf16>, vector<256x32xf32> -> vector<256x32xf32>
    %20 = arith.addf %14, %19 : vector<256x32xf32>
    %21 = vector.extract_strided_slice %1 {offsets = [1, 1, 0], sizes = [16, 16, 12], strides = [1, 1, 1]} : vector<17x17x12xbf16> to vector<16x16x12xbf16>
    %22 = vector.shape_cast %21 : vector<16x16x12xbf16> to vector<256x12xbf16>
    %c3 = arith.constant 3 : index
    %c0_13 = arith.constant 0 : index
    %c0_14 = arith.constant 0 : index
    %23 = vector.load %arg2[%c3, %c0_13, %c0_14] : memref<4x12x32xbf16, #tpu.memory_space<vmem>>, vector<1x12x32xbf16>
    %24 = vector.shape_cast %23 : vector<1x12x32xbf16> to vector<12x32xbf16>
    %cst_15 = arith.constant dense<0.000000e+00> : vector<256x32xf32>
    %25 = tpu.matmul %22, %24, %cst_15 {dimension_numbers = #tpu.dot_dimension_numbers<[1], [0], [0], [1], [0, 0, 1, 1], [], []>} : vector<256x12xbf16>, vector<12x32xbf16>, vector<256x32xf32> -> vector<256x32xf32>
    %26 = arith.addf %20, %25 : vector<256x32xf32>
    %c0_16 = arith.constant 0 : index
    %c0_17 = arith.constant 0 : index
    %27 = vector.load %arg3[%c0_16, %c0_17] : memref<1x32xf32, #tpu.memory_space<vmem>>, vector<1x32xf32>
    %28 = vector.broadcast %27 : vector<1x32xf32> to vector<256x32xf32>
    %29 = arith.addf %26, %28 : vector<256x32xf32>
    %cst_18 = arith.constant 0.000000e+00 : f32
    %cst_19 = arith.constant 6.000000e+00 : f32
    %30 = vector.broadcast %cst_18 : f32 to vector<256x32xf32>
    %31 = arith.maximumf %30, %29 : vector<256x32xf32>
    %32 = vector.broadcast %cst_19 : f32 to vector<256x32xf32>
    %33 = arith.minimumf %32, %31 : vector<256x32xf32>
    %34 = vector.shape_cast %33 : vector<256x32xf32> to vector<1x16x16x32xf32>
    %35 = arith.truncf %34 : vector<1x16x16x32xf32> to vector<1x16x16x32xbf16>
    %c0_20 = arith.constant 0 : index
    %c0_21 = arith.constant 0 : index
    %c0_22 = arith.constant 0 : index
    %c0_23 = arith.constant 0 : index
    %36 = vector.load %arg4[%c0_20, %c0_21, %c0_22, %c0_23] : memref<1x16x16x32xbf16, #tpu.memory_space<vmem>>, vector<1x16x16x32xbf16>
    tpu.vector_store %arg4[%c0_20, %c0_21, %c0_22, %c0_23], %35 {strides = array<i32>} : memref<1x16x16x32xbf16, #tpu.memory_space<vmem>>, vector<1x16x16x32xbf16>,
    return
  }
  func.func @transform_0(%arg0: i32) -> (i32, i32, i32, i32) {
    %c0_i32 = arith.constant 0 : i32
    %c0_i32_0 = arith.constant 0 : i32
    %c0_i32_1 = arith.constant 0 : i32
    %c0_i32_2 = arith.constant 0 : i32
    return %arg0, %c0_i32, %c0_i32_0, %c0_i32_1 : i32, i32, i32, i32
  }
  func.func @transform_1(%arg0: i32) -> (i32, i32, i32) {
    %c0_i32 = arith.constant 0 : i32
    %c0_i32_0 = arith.constant 0 : i32
    %c0_i32_1 = arith.constant 0 : i32
    %c0_i32_2 = arith.constant 0 : i32
    return %c0_i32, %c0_i32_0, %c0_i32_1 : i32, i32, i32
  }
  func.func @transform_2(%arg0: i32) -> (i32, i32) {
    %c0_i32 = arith.constant 0 : i32
    %c0_i32_0 = arith.constant 0 : i32
    %c0_i32_1 = arith.constant 0 : i32
    return %c0_i32, %c0_i32_0 : i32, i32
  }
  func.func @transform_3(%arg0: i32) -> (i32, i32, i32, i32) {
    %c0_i32 = arith.constant 0 : i32
    %c0_i32_0 = arith.constant 0 : i32
    %c0_i32_1 = arith.constant 0 : i32
    %c0_i32_2 = arith.constant 0 : i32
    return %arg0, %c0_i32, %c0_i32_0, %c0_i32_1 : i32, i32, i32, i32
  }
}

</mosaic_0001>

<bundles_post_ra>
// kernel: tpu_custom_call.1
= control target key start
LH: loop header
LB: loop body
LE: loop exit
PB: predicated region body
PF: predicated region fallthrough
CT: control target
= control target key end

     0   :  { %8 = vsyncpa [#allocation3], 0  ;;  %s3334_s0 = inlined_call_operand.vmem [shape: bf16[2,17,17,12], index: 0, kind: input, shape index: {}]   ;;  %s3335_s1 = inlined_call_operand.vmem [shape: bf16[4,12,32], index: 1, kind: input, shape index: {}]   ;;  %s3336_s2 = inlined_call_operand.vmem [shape: f32[1,32], index: 2, kind: input, shape index: {}]   ;;  %s3337_s3 = inlined_call_operand.hbm [shape: bf16[2,16,16,32], index: 3, kind: output, shape index: {}]  }
   0x1   :  { %10 = vsyncpa [#allocation3 + $0x1], 0  ;;  %s2602_s12 = smov 0   ;;  %s2604_s13 = smov 0  }
   0x2   :  { %s2606_s14 = smov 0   ;;  %s2608_s15 = smov 0  }
   0x3 LB: > { %s2623_s16 = sadd.s32 4294967295, %s2577_s15   ;;  %s1963_s17 = sadd.s32 4294967294, %s2577_s15   ;;  %s2577_s15 = sphi %s2608_s15, %s3345_s15   ;;  %s2573_s14 = sphi %s2606_s14, %s3344_s14   ;;  %s2569_s13 = sphi %s2604_s13, %s3343_s13   ;;  %s2565_s12 = sphi %s2602_s12, %s3342_s12  }
   0x4   : > { %s2627_s18 = sadd.s32 1, %s2577_s15   ;;  %s91_s19 = sadd.s32 1, %s2573_s14 }
   0x5   : > { %s88_s20 = ssub.s32 %s2577_s15, %s2627_s18  ;;  %p101_p0 = scmp.ne.s32.totalorder %s2573_s14, %s2569_s13 }
   0x6   : > { %p89_p1 = scmp.eq.s32.totalorder %s88_s20, 0  ;;  %p102_p2 = scmp.eq.s32.totalorder %s2623_s16, 1 }
   0x7   : > { %p107_p3 = scmp.ne.s32.totalorder %s2569_s13, %s2565_s12  ;;  %p108_p4 = scmp.eq.s32.totalorder %s1963_s17, 1 }
   0x8   : > { %s2638_s21 = scalar_select %p89_p1, %s2573_s14, %s91_s19  }
   0x9   : > { %p2640_p5 = por %p102_p2, %p101_p0  ;;  %p2644_p6 = por %p108_p4, %p107_p3 }
   0xa   : > { %p1966_p7 = scmp.ge.s32.totalorder %s2577_s15, 1  ;;  %p140_p8 = scmp.lt.s32.totalorder %s2577_s15, 3 }
   0xc   : > { %p141_p9 = pnand %p1966_p7, %p140_p8 }
   0xd   : > { %vm715_vm0 = vcmask (!%p141_p9), 1045504   ;;  %p164_p10 = scmp.lt.s32.totalorder (!%p141_p9), %s2623_s16, 1  ;;  %v2494_v0 = vld [vmem:[%s3335_s1 + $0x10] sm:$0x3f] (!%p141_p9)   ;;  %v2497_v1 = vld [vmem:[%s3335_s1 + $0x8] sm:$0x3f] (!%p141_p9)  }
   0xe   : > { %144 = sbr.rel (%p141_p9) target bundleno = 412 (0x19c), region = 32  ;;  %2450 = vmatprep.subr.msk.bf16.mxu0 (!%p141_p9), %vm715_vm0, %v2494_v0  ;;  %v1194_v2 = vsel (!%p141_p9), %vm715_vm0, %v2494_v0, 0  ;;  %2448 = vmatprep.subr.msk.bf16.mxu1 (!%p141_p9), %vm715_vm0, %v2497_v1  ;;  %v717_v3 = vsel (!%p141_p9), %vm715_vm0, %v2497_v1, 0  ;;  %v2665_v4 = vld [vmem:[%s3335_s1] sm:$0x3f] (!%p141_p9)   ;;  %vm666_vm1 = vcmask (!%p141_p9), 97280  }
   0xf   : > { %2285 = vmatpush3.bf16.msra.mxu0 (!%p141_p9), %v1194_v2  ;;  %2217 = vmatpush3.bf16.msra.mxu1 (!%p141_p9), %v717_v3  ;;  %v2675_v5 = vld [vmem:[%s3335_s1 + $0x18] sm:$0x3f] (!%p141_p9)   ;;  %vm223_vm2 = vsmask.f32 (!%p141_p9), 3328  ;;  %vm224_vm3 = vsmask.f32 (!%p141_p9), 7440 }
  0x10   : > { %2449 = vmatprep.subr.msk.bf16.mxu1 (!%p141_p9), %vm715_vm0, %v2665_v4  ;;  %2451 = vmatprep.subr.msk.bf16.mxu0 (!%p141_p9), %vm715_vm0, %v2675_v5  ;;  %vm2730_vm4 = vmor (!%p141_p9), %vm223_vm2, %vm224_vm3  ;;  %s161_s17 = sand.u32 (!%p141_p9), 1, %s2569_s13   ;;  %vm1854_vm5 = vcmask (!%p141_p9), 257024   ;;  %s2147_s24 = sshll.u32 (!%p141_p9), %s2623_s16, 11 }
  0x11   : > { %s1967_s19 = sshll.u32 (!%p141_p9), %s161_s17, 7  ;;  %s3281_s28 = scalar_lea.hbm (!%p141_p9), %s3337_s3, %s2147_s24 }
  0x12   : > { %s3143_s20 = scalar_lea.vmem (!%p141_p9), [#allocation2], %s1967_s19  ;;  %s2579_s30 = smov (!%p141_p9), [#allocation2]  }
  0x13   : > { %s1901_s25 = sshll.u32 (!%p141_p9), %s3143_s20, 4  ;;  %s2519_s4 = sshll.u32 (!%p141_p9), %s2579_s30, 4  ;;  %s3283_s25 = int_to_ptr.vmem [resolvable:$true] %s1901_s25  ;;  %s2520_s4 = int_to_ptr.vmem [resolvable:$false] %s2519_s4 }
  0x14   : > { %s2521_s5 = scalar_lea.vmem (!%p141_p9), %s2520_s4, 4096  ;;  %p2522_p0 = scmp.lt.s32.totalorder (!%p141_p9), %s3283_s25, %s2520_s4 }
  0x15   : > { %s165_s26 = scalar_select %p164_p10, %s2623_s16, 1 }
  0x16   : > { %s3293_s16 = scalar_lea.sflag [#allocation3], %s161_s17 }
  0x17   : > { %s2452_s29 = smul.u32 204, %s165_s26 }
  0x19   : > { %s2670_s7 = scalar_lea.vmem %s3334_s0, %s2452_s29  ;;  %s2515_s29 = scalar_lea.vmem %s3283_s25, 2048 }
  0x1a   : > { %v173_v6 = vld [vmem:[%s2670_s7 + $0xc] sm:$0xf]  ;;  %v174_v7 = vld [vmem:[%s2670_s7 + $0x10] sm:$0xf]  ;;  %v176_v8 = vld [vmem:[%s2670_s7 + $0x18] sm:$0xf]  ;;  %p2516_p11 = scmp.ne.s32.totalorder %s3283_s25, %s2515_s29  ;;  %p2523_p1 = scmp.lt.s32.totalorder %s2521_s5, %s2515_s29 }
  0x1b   : > { %v251_v9 = vshrl.u32 %v173_v6, 16  ;;  %v254_v10 = vshll.u32 %v173_v6, 16  ;;  %v260_v11 = vshll.u32 %v174_v7, 16  ;;  %v264_v12 = vshrl.u32 %v174_v7, 16  ;;  %v177_v13 = vld [vmem:[%s2670_s7 + $0x1c] sm:$0xf] }
  0x1c   : > { %v2685_v14 = vcombine.low %v173_v6, %v174_v7  ;;  %v275_v15 = vshrl.u32 %v176_v8, 16  ;;  %v278_v16 = vshll.u32 %v176_v8, 16  ;;  %v284_v17 = vshll.u32 %v177_v13, 16  ;;  %v179_v23 = vld [vmem:[%s2670_s7 + $0x24] sm:$0xf]  ;;  %p2517_p12 = pnand %p2516_p11, %p2640_p5  ;;  %p2524_p2 = por %p2523_p1, %p2522_p0 }
  0x1d   : > { %v253_v18 = vrot.slane %v251_v9, 4  ;;  %v256_v19 = vrot.slane %v254_v10, 5  ;;  %v2687_v20 = vrot.slane %v260_v11, 5  ;;  %v266_v21 = vrot.slane %v264_v12, 4  ;;  %v180_v24 = vld [vmem:[%s2670_s7 + $0x28] sm:$0xf] }
  0x1e   : > { %2286 = vmatprep.mubr.msk.bf16.mxu0 %vm666_vm1, %v2685_v14  ;;  %v288_v22 = vshrl.u32 %v177_v13, 16  ;;  %v2693_v25 = vcombine.low %v176_v8, %v177_v13  ;;  %v2696_v26 = vld [vmem:[%s2670_s7] sm:$0xf]  ;;  %v2699_v29 = vrot.slane %v275_v15, 4  ;;  %v2701_v30 = vrot.slane %v278_v16, 5  ;;  %p2518_p13 = pneg %p2517_p12 }
  0x1f   : > { %v257_v27 = vor.u32 %v256_v19, %v253_v18  ;;  %v267_v28 = vor.u32 %v266_v21, %v2687_v20  ;;  %v2704_v31 = vld [vmem:[%s2670_s7 + $0x4] sm:$0xf]  ;;  %v172_v32 = vld [vmem:[%s2670_s7 + $0x8] sm:$0x1]  ;;  %v2707_v33 = vrot.slane %v284_v17, 5  ;;  %v299_v35 = vshrl.u32 %v179_v23, 16 }
  0x20   : > { %v2709_v34 = vrot.slane %v288_v22, 4  ;;  %2287 = vmatmul.mubr.msk.bf16.vlgmr.msra.gmra.mrb[0].mxu0 %vm666_vm1, %v2693_v25  ;;  %v2713_v36 = vcombine.low %v179_v23, %v180_v24  ;;  %v302_v37 = vshll.u32 %v179_v23, 16  ;;  %v308_v38 = vshll.u32 %v180_v24, 16  ;;  %v182_v45 = vld [vmem:[%s2670_s7 + $0x30] sm:$0xf]  ;;  %p2525_p3 = pnand %p2524_p2, %p2518_p13 }
  0x21   : > { %v312_v39 = vshrl.u32 %v180_v24, 16  ;;  %v227_v40 = vshrl.u32 %v2696_v26, 16  ;;  %v230_v41 = vshll.u32 %v2696_v26, 16  ;;  %v236_v42 = vshll.u32 %v2704_v31, 16  ;;  %v183_v49 = vld [vmem:[%s2670_s7 + $0x34] sm:$0xf] }
  0x22   : > { %2290 = vmatprep.mubr.msk.bf16.mxu0 %vm666_vm1, %v2713_v36  ;;  %v240_v43 = vshrl.u32 %v2704_v31, 16  ;;  %v246_v44 = vshll.u32 %v172_v32, 16  ;;  %v258_v46 = vrot.slane %v257_v27, 4  ;;  %v268_v47 = vrot.slane %v267_v28, 4  ;;  %v175_v55 = vld [vmem:[%s2670_s7 + $0x14] sm:$0x1] }
  0x23   : > { %v229_v48 = vrot.slane %v227_v40, 4  ;;  %v323_v50 = vshrl.u32 %v182_v45, 16  ;;  %v232_v51 = vrot.slane %v230_v41, 5  ;;  %v238_v52 = vrot.slane %v236_v42, 5  ;;  %v185_v1 = vld [vmem:[%s2670_s7 + $0x3c] sm:$0xf] }
  0x24   : > { %v242_v53 = vrot.slane %v240_v43, 4  ;;  %v326_v54 = vshll.u32 %v182_v45, 16  ;;  %v2724_v56 = vrot.slane %v299_v35, 4  ;;  %v2726_v57 = vrot.slane %v302_v37, 5  ;;  %v186_v2 = vld [vmem:[%s2670_s7 + $0x40] sm:$0xf] }
  0x25   : > { %v248_v58 = vrot.slane %v246_v44, 5  ;;  %v332_v59 = vshll.u32 %v183_v49, 16  ;;  %v233_v61 = vor.u32 %v232_v51, %v229_v48  ;;  %v336_v63 = vshrl.u32 %v183_v49, 16  ;;  %v188_v28 = vld [vmem:[%s2670_s7 + $0x48] sm:$0xf] }
  0x26   : > { %v243_v62 = vor.u32 %v242_v53, %v238_v52  ;;  %v2734_v0 = vcombine.low %v182_v45, %v183_v49  ;;  %v2738_v3 = vrot.slane %v308_v38, 5  ;;  %v314_v6 = vrot.slane %v312_v39, 4  ;;  %v189_v32 = vld [vmem:[%s2670_s7 + $0x4c] sm:$0xf]  ;;  %v191_v49 = vld [vmem:[%s2670_s7 + $0x54] sm:$0xf] }
  0x27   : > { %v270_v7 = vshll.u32 %v175_v55, 16  ;;  %v1428_v8 = vsel %vm715_vm0, %v2675_v5, 0  ;;  %v234_v9 = vrot.slane %v233_v61, 4  ;;  %v2742_v11 = vrot.slane %v323_v50, 4  ;;  %v178_v5 = vld [vmem:[%s2670_s7 + $0x20] sm:$0x1] }
  0x28   : > { %v244_v10 = vrot.slane %v243_v62, 4  ;;  %v2744_v12 = vrot.slane %v326_v54, 5  ;;  %2291 = vmatmul.mubr.msk.bf16.gmra.mrb[4].mxu0 %vm666_vm1, %v2734_v0  ;;  %v263_v13 = vsel %vm2730_vm4, %v258_v46, %v2687_v20  ;;  %v347_v16 = vshrl.u32 %v185_v1, 16  ;;  %v192_v54 = vld [vmem:[%s2670_s7 + $0x58] sm:$0xf] }
  0x29   : > { %v272_v15 = vrot.slane %v270_v7, 5  ;;  %2319 = vmatpush3.bf16.msra.mxu0 %v1428_v8  ;;  %v2751_v17 = vcombine.low %v185_v1, %v186_v2  ;;  %v239_v18 = vsel %vm2730_vm4, %v234_v9, %v238_v52  ;;  %v2758_v21 = vrot.slane %v332_v59, 5 }
  0x2a   : > { %v249_v19 = vsel %vm2730_vm4, %v244_v10, %v248_v58  ;;  %v2760_v22 = vrot.slane %v336_v63, 4  ;;  %v1014_v24 = vsel %vm715_vm0, %v2665_v4, 0  ;;  %v350_v27 = vshll.u32 %v185_v1, 16 }
  0x2b   : > { %v1971_v23 = vcombine.low %v239_v18, %v249_v19  ;;  %v273_v20 = vsel %vm2730_vm4, %v268_v47, %v272_v15  ;;  %2294 = vmatprep.mubr.msk.bf16.mxu0 %vm666_vm1, %v2751_v17  ;;  %v281_v37 = vor.u32 %v2701_v30, %v2699_v29  ;;  %v291_v38 = vor.u32 %v2709_v34, %v2707_v33  ;;  %v181_v30 = vld [vmem:[%s2670_s7 + $0x2c] sm:$0x1]  ;;  %v194_v19 = vld [vmem:[%s2670_s7 + $0x60] sm:$0xf] }
  0x2c   : > { %v2770_v35 = vcombine.low %v263_v13, %v273_v20  ;;  %v294_v39 = vshll.u32 %v178_v5, 16  ;;  %v2777_v4 = vrot.slane %v347_v16, 4  ;;  %v356_v40 = vshll.u32 %v186_v2, 16 }
  0x2d   : > { %2218 = vmatprep.mubr.msk.bf16.mxu1 %vm666_vm1, %v1971_v23  ;;  %v360_v41 = vshrl.u32 %v186_v2, 16  ;;  %v371_v42 = vshrl.u32 %v188_v28, 16  ;;  %v282_v43 = vrot.slane %v281_v37, 4  ;;  %v292_v44 = vrot.slane %v291_v38, 4  ;;  %v184_v2 = vld [vmem:[%s2670_s7 + $0x38] sm:$0x1] }
  0x2e   : > { %2219 = vmatmul.mubr.msk.bf16.vlgmr.msra.gmra.mrb[0].mxu1 %vm666_vm1, %v2770_v35  ;;  %v296_v45 = vrot.slane %v294_v39, 5  ;;  %v2781_v29 = vcombine.low %v188_v28, %v189_v32  ;;  %v352_v34 = vrot.slane %v350_v27, 5  ;;  %v374_v46 = vshll.u32 %v188_v28, 16  ;;  %v195_v23 = vld [vmem:[%s2670_s7 + $0x64] sm:$0xf] }
  0x2f   : > { %2251 = vmatpush3.bf16.msra.mxu1 %v1014_v24  ;;  %v380_v47 = vshll.u32 %v189_v32, 16  ;;  %v384_v48 = vshrl.u32 %v189_v32, 16  ;;  %v287_v50 = vsel %vm2730_vm4, %v282_v43, %v2707_v33  ;;  %v305_v52 = vor.u32 %v2726_v57, %v2724_v56  ;;  %v187_v37 = vld [vmem:[%s2670_s7 + $0x44] sm:$0x1] }
  0x30   : > { %v297_v51 = vsel %vm2730_vm4, %v292_v44, %v296_v45  ;;  %2295 = vmatmul.mubr.msk.bf16.gmra.mrb[8].mxu0 %vm666_vm1, %v2781_v29  ;;  %v315_v53 = vor.u32 %v314_v6, %v2738_v3  ;;  %v2796_v55 = vrot.slane %v356_v40, 5  ;;  %v362_v58 = vrot.slane %v360_v41, 4  ;;  %v197_v41 = vld [vmem:[%s2670_s7 + $0x6c] sm:$0xf] }
  0x31   : > { %v2798_v59 = vcombine.low %v287_v50, %v297_v51  ;;  %v318_v61 = vshll.u32 %v181_v30, 16  ;;  %v2800_v62 = vrot.slane %v371_v42, 4  ;;  %v306_v33 = vrot.slane %v305_v52, 4  ;;  %v198_v30 = vld [vmem:[%s2670_s7 + $0x70] sm:$0xf] }
  0x32   : > { %v316_v63 = vrot.slane %v315_v53, 4  ;;  %v395_v1 = vshrl.u32 %v191_v49, 16  ;;  %v2805_v56 = vrot.slane %v374_v46, 5  ;;  %v398_v6 = vshll.u32 %v191_v49, 16  ;;  %v190_v53 = vld [vmem:[%s2670_s7 + $0x50] sm:$0x1] }
  0x33   : > { %2222 = vmatprep.mubr.msk.bf16.mxu1 %vm666_vm1, %v2798_v59  ;;  %v320_v57 = vrot.slane %v318_v61, 5  ;;  %v2807_v7 = vcombine.low %v191_v49, %v192_v54  ;;  %v2809_v8 = vrot.slane %v380_v47, 5  ;;  %v386_v9 = vrot.slane %v384_v48, 4 }
  0x34   : > { %v311_v10 = vsel %vm2730_vm4, %v306_v33, %v2738_v3  ;;  %v329_v13 = vor.u32 %v2744_v12, %v2742_v11  ;;  %v404_v16 = vshll.u32 %v192_v54, 16  ;;  %v339_v5 = vor.u32 %v2760_v22, %v2758_v21 }
  0x35   : > { %v321_v15 = vsel %vm2730_vm4, %v316_v63, %v320_v57  ;;  %2298 = vmatprep.mubr.msk.bf16.mxu0 %vm666_vm1, %v2807_v7  ;;  %v342_v18 = vshll.u32 %v184_v2, 16  ;;  %v2826_v3 = vrot.slane %v395_v1, 4  ;;  %v408_v11 = vshrl.u32 %v192_v54, 16 }
  0x36   : > { %v2824_v20 = vcombine.low %v311_v10, %v321_v15  ;;  %v330_v12 = vrot.slane %v329_v13, 4  ;;  %v2828_v24 = vrot.slane %v398_v6, 5  ;;  %v340_v27 = vrot.slane %v339_v5, 4  ;;  %v200_v13 = vld [vmem:[%s2670_s7 + $0x78] sm:$0xf] }
  0x37   : > { %v344_v28 = vrot.slane %v342_v18, 5  ;;  %v419_v32 = vshrl.u32 %v194_v19, 16  ;;  %v422_v38 = vshll.u32 %v194_v19, 16  ;;  %v428_v39 = vshll.u32 %v195_v23, 16  ;;  %v201_v15 = vld [vmem:[%s2670_s7 + $0x7c] sm:$0xf] }
  0x38   : > { %2223 = vmatmul.mubr.msk.bf16.gmra.mrb[4].mxu1 %vm666_vm1, %v2824_v20  ;;  %v335_v22 = vsel %vm2730_vm4, %v330_v12, %v2758_v21  ;;  %v2836_v40 = vcombine.low %v194_v19, %v195_v23  ;;  %v432_v43 = vshrl.u32 %v195_v23, 16  ;;  %v353_v44 = vor.u32 %v352_v34, %v2777_v4 }
  0x39   : > { %v345_v42 = vsel %vm2730_vm4, %v340_v27, %v344_v28  ;;  %v363_v45 = vor.u32 %v362_v58, %v2796_v55  ;;  %v2844_v46 = vrot.slane %v404_v16, 5  ;;  %v410_v47 = vrot.slane %v408_v11, 4  ;;  %v193_v11 = vld [vmem:[%s2670_s7 + $0x5c] sm:$0x1] }
  0x3a   : > { %v2846_v48 = vcombine.low %v335_v22, %v345_v42  ;;  %2299 = vmatmul.mubr.msk.bf16.gmra.mrb[12].mxu0 %vm666_vm1, %v2836_v40  ;;  %v366_v21 = vshll.u32 %v187_v37, 16  ;;  %v2850_v49 = vrot.slane %v419_v32, 4  ;;  %v354_v50 = vrot.slane %v353_v44, 4 }
  0x3b   : > { %v364_v51 = vrot.slane %v363_v45, 4  ;;  %v443_v52 = vshrl.u32 %v197_v41, 16  ;;  %v2855_v4 = vrot.slane %v422_v38, 5  ;;  %v2857_v34 = vrot.slane %v428_v39, 5  ;;  %v203_v39 = vld [vmem:[%s2670_s7 + $0x84] sm:$0xf] }
  0x3c   : > { %2226 = vmatprep.mubr.msk.bf16.mxu1 %vm666_vm1, %v2846_v48  ;;  %v368_v54 = vrot.slane %v366_v21, 5  ;;  %v2859_v58 = vcombine.low %v197_v41, %v198_v30  ;;  %v434_v61 = vrot.slane %v432_v43, 4  ;;  %v359_v33 = vsel %vm2730_vm4, %v354_v50, %v2796_v55 }
  0x3d   : > { %v446_v63 = vshll.u32 %v197_v41, 16  ;;  %v377_v1 = vor.u32 %v2805_v56, %v2800_v62  ;;  %v452_v57 = vshll.u32 %v198_v30, 16  ;;  %v387_v6 = vor.u32 %v386_v9, %v2809_v8  ;;  %v204_v41 = vld [vmem:[%s2670_s7 + $0x88] sm:$0xf] }
  0x3e   : > { %v369_v2 = vsel %vm2730_vm4, %v364_v51, %v368_v54  ;;  %2302 = vmatprep.mubr.msk.bf16.mxu0 %vm666_vm1, %v2859_v58  ;;  %v390_v10 = vshll.u32 %v190_v53, 16  ;;  %v2875_v55 = vrot.slane %v443_v52, 4  ;;  %v456_v5 = vshrl.u32 %v198_v30, 16 }
  0x3f   : > { %v2873_v16 = vcombine.low %v359_v33, %v369_v2  ;;  %v378_v62 = vrot.slane %v377_v1, 4  ;;  %v388_v56 = vrot.slane %v387_v6, 4  ;;  %v467_v19 = vshrl.u32 %v200_v13, 16 }
  0x40   : > { %v392_v18 = vrot.slane %v390_v10, 5  ;;  %v470_v23 = vshll.u32 %v200_v13, 16  ;;  %v2880_v9 = vrot.slane %v446_v63, 5  ;;  %v476_v27 = vshll.u32 %v201_v15, 16  ;;  %v206_v10 = vld [vmem:[%s2670_s7 + $0x90] sm:$0xf] }
  0x41   : > { %2227 = vmatmul.mubr.msk.bf16.gmra.mrb[8].mxu1 %vm666_vm1, %v2873_v16  ;;  %v383_v12 = vsel %vm2730_vm4, %v378_v62, %v2809_v8  ;;  %v2885_v28 = vcombine.low %v200_v13, %v201_v15  ;;  %v480_v37 = vshrl.u32 %v201_v15, 16  ;;  %v401_v22 = vor.u32 %v2828_v24, %v2826_v3  ;;  %v196_v3 = vld [vmem:[%s2670_s7 + $0x68] sm:$0x1]  ;;  %v207_v13 = vld [vmem:[%s2670_s7 + $0x94] sm:$0xf] }
  0x42   : > { %v393_v32 = vsel %vm2730_vm4, %v388_v56, %v392_v18  ;;  %v411_v38 = vor.u32 %v410_v47, %v2844_v46  ;;  %v2894_v42 = vrot.slane %v452_v57, 5  ;;  %v458_v43 = vrot.slane %v456_v5, 4 }
  0x43   : > { %v2896_v44 = vcombine.low %v383_v12, %v393_v32  ;;  %2303 = vmatmul.mubr.msk.bf16.gmra.mrb[16].mxu0 %vm666_vm1, %v2885_v28  ;;  %v414_v8 = vshll.u32 %v193_v11, 16  ;;  %v2900_v45 = vrot.slane %v467_v19, 4  ;;  %v2902_v30 = vrot.slane %v470_v23, 5  ;;  %v199_v19 = vld [vmem:[%s2670_s7 + $0x74] sm:$0x1] }
  0x44   : > { %v402_v21 = vrot.slane %v401_v22, 4  ;;  %v412_v50 = vrot.slane %v411_v38, 4  ;;  %v2907_v24 = vrot.slane %v476_v27, 5  ;;  %v491_v51 = vshrl.u32 %v203_v39, 16  ;;  %v209_v38 = vld [vmem:[%s2670_s7 + $0x9c] sm:$0xf] }
  0x45   : > { %2230 = vmatprep.mubr.msk.bf16.mxu1 %vm666_vm1, %v2896_v44  ;;  %v416_v47 = vrot.slane %v414_v8, 5  ;;  %v2909_v52 = vcombine.low %v203_v39, %v204_v41  ;;  %v482_v53 = vrot.slane %v480_v37, 4  ;;  %v494_v33 = vshll.u32 %v203_v39, 16  ;;  %v210_v39 = vld [vmem:[%s2670_s7 + $0xa0] sm:$0xf] }
  0x46   : > { %v407_v54 = vsel %vm2730_vm4, %v402_v21, %v2844_v46  ;;  %v425_v63 = vor.u32 %v2855_v4, %v2850_v49  ;;  %v500_v2 = vshll.u32 %v204_v41, 16  ;;  %v435_v57 = vor.u32 %v434_v61, %v2857_v34 }
  0x47   : > { %v417_v1 = vsel %vm2730_vm4, %v412_v50, %v416_v47  ;;  %2306 = vmatprep.mubr.msk.bf16.mxu0 %vm666_vm1, %v2909_v52  ;;  %v438_v6 = vshll.u32 %v196_v3, 16  ;;  %v504_v46 = vshrl.u32 %v204_v41, 16  ;;  %v515_v62 = vshrl.u32 %v206_v10, 16 }
  0x48   : > { %v2923_v15 = vcombine.low %v407_v54, %v417_v1  ;;  %v426_v5 = vrot.slane %v425_v63, 4  ;;  %v2925_v49 = vrot.slane %v491_v51, 4  ;;  %v436_v4 = vrot.slane %v435_v57, 4 }
  0x49   : > { %v440_v56 = vrot.slane %v438_v6, 5  ;;  %v518_v18 = vshll.u32 %v206_v10, 16  ;;  %v2930_v61 = vrot.slane %v494_v33, 5  ;;  %v524_v11 = vshll.u32 %v207_v13, 16 }
  0x4a   : > { %2231 = vmatmul.mubr.msk.bf16.gmra.mrb[12].mxu1 %vm666_vm1, %v2923_v15  ;;  %v431_v23 = vsel %vm2730_vm4, %v426_v5, %v2857_v34  ;;  %v2935_v12 = vcombine.low %v206_v10, %v207_v13  ;;  %v2937_v27 = vrot.slane %v500_v2, 5  ;;  %v449_v37 = vor.u32 %v2880_v9, %v2875_v55  ;;  %v202_v55 = vld [vmem:[%s2670_s7 + $0x80] sm:$0x1]  ;;  %v212_v5 = vld [vmem:[%s2670_s7 + $0xa8] sm:$0xf] }
  0x4b   : > { %v441_v32 = vsel %vm2730_vm4, %v436_v4, %v440_v56  ;;  %v459_v22 = vor.u32 %v458_v43, %v2894_v42  ;;  %v506_v41 = vrot.slane %v504_v46, 4  ;;  %v2948_v34 = vrot.slane %v515_v62, 4  ;;  %v213_v62 = vld [vmem:[%s2670_s7 + $0xac] sm:$0xf] }
  0x4c   : > { %v2946_v8 = vcombine.low %v431_v23, %v441_v32  ;;  %2307 = vmatmul.mubr.msk.bf16.gmra.mrb[20].mxu0 %vm666_vm1, %v2935_v12  ;;  %v462_v21 = vshll.u32 %v199_v19, 16  ;;  %v2952_v50 = vrot.slane %v518_v18, 5  ;;  %v528_v3 = vshrl.u32 %v207_v13, 16 }
  0x4d   : > { %v450_v47 = vrot.slane %v449_v37, 4  ;;  %v460_v51 = vrot.slane %v459_v22, 4  ;;  %v2957_v9 = vrot.slane %v524_v11, 5  ;;  %v539_v54 = vshrl.u32 %v209_v38, 16  ;;  %v205_v11 = vld [vmem:[%s2670_s7 + $0x8c] sm:$0x1] }
  0x4e   : > { %2234 = vmatprep.mubr.msk.bf16.mxu1 %vm666_vm1, %v2946_v8  ;;  %v464_v43 = vrot.slane %v462_v21, 5  ;;  %v2959_v33 = vcombine.low %v209_v38, %v210_v39  ;;  %v542_v1 = vshll.u32 %v209_v38, 16  ;;  %v548_v2 = vshll.u32 %v210_v39, 16  ;;  %v215_v38 = vld [vmem:[%s2670_s7 + $0xb4] sm:$0xf] }
  0x4f   : > { %v455_v63 = vsel %vm2730_vm4, %v450_v47, %v2894_v42  ;;  %v473_v57 = vor.u32 %v2902_v30, %v2900_v45  ;;  %v552_v10 = vshrl.u32 %v210_v39, 16  ;;  %v483_v13 = vor.u32 %v482_v53, %v2907_v24 }
  0x50   : > { %v465_v6 = vsel %vm2730_vm4, %v460_v51, %v464_v43  ;;  %2310 = vmatprep.mubr.msk.bf16.mxu0 %vm666_vm1, %v2959_v33  ;;  %v486_v46 = vshll.u32 %v202_v55, 16  ;;  %v530_v42 = vrot.slane %v528_v3, 4  ;;  %v563_v18 = vshrl.u32 %v212_v5, 16  ;;  %v216_v51 = vld [vmem:[%s2670_s7 + $0xb8] sm:$0xf] }
  0x51   : > { %v2973_v4 = vcombine.low %v455_v63, %v465_v6  ;;  %v474_v56 = vrot.slane %v473_v57, 4  ;;  %v541_v45 = vrot.slane %v539_v54, 4  ;;  %v484_v30 = vrot.slane %v483_v13, 4  ;;  %v208_v55 = vld [vmem:[%s2670_s7 + $0x98] sm:$0x1] }
  0x52   : > { %v488_v19 = vrot.slane %v486_v46, 5  ;;  %v566_v23 = vshll.u32 %v212_v5, 16  ;;  %v544_v53 = vrot.slane %v542_v1, 5  ;;  %v2978_v32 = vrot.slane %v548_v2, 5  ;;  %v2998_v1 = vld [vmem:[%s2670_s7 + $0xc0] sm:$0xf] }
  0x53   : > { %2235 = vmatmul.mubr.msk.bf16.gmra.mrb[16].mxu1 %vm666_vm1, %v2973_v4  ;;  %v479_v37 = vsel %vm2730_vm4, %v474_v56, %v2907_v24  ;;  %v2983_v22 = vcombine.low %v212_v5, %v213_v62  ;;  %v554_v39 = vrot.slane %v552_v10, 4  ;;  %v497_v3 = vor.u32 %v2930_v61, %v2925_v49  ;;  %v3001_v13 = vld [vmem:[%s2670_s7 + $0xc4] sm:$0xf] }
  0x54   : > { %v489_v21 = vsel %vm2730_vm4, %v484_v30, %v488_v19  ;;  %v507_v47 = vor.u32 %v506_v41, %v2937_v27  ;;  %v565_v54 = vrot.slane %v563_v18, 4  ;;  %v572_v63 = vshll.u32 %v213_v62, 16 }
  0x55   : > { %v2993_v43 = vcombine.low %v479_v37, %v489_v21  ;;  %2311 = vmatmul.mubr.msk.bf16.gmra.mrb[24].mxu0 %vm666_vm1, %v2983_v22  ;;  %v510_v24 = vshll.u32 %v205_v11, 16  ;;  %v568_v2 = vrot.slane %v566_v23, 5  ;;  %v576_v57 = vshrl.u32 %v213_v62, 16 }
  0x56   : > { %v498_v6 = vrot.slane %v497_v3, 4  ;;  %v508_v10 = vrot.slane %v507_v47, 4  ;;  %v587_v61 = vshrl.u32 %v215_v38, 16  ;;  %v590_v41 = vshll.u32 %v215_v38, 16 }
  0x57   : > { %2238 = vmatprep.mubr.msk.bf16.mxu1 %vm666_vm1, %v2993_v43  ;;  %v512_v49 = vrot.slane %v510_v24, 5  ;;  %v3005_v46 = vcombine.low %v215_v38, %v216_v51  ;;  %v596_v56 = vshll.u32 %v216_v51, 16  ;;  %v600_v18 = vshrl.u32 %v216_v51, 16  ;;  %v211_v51 = vld [vmem:[%s2670_s7 + $0xa4] sm:$0x1] }
  0x58   : > { %v503_v5 = vsel %vm2730_vm4, %v498_v6, %v2937_v27  ;;  %v521_v62 = vor.u32 %v2952_v50, %v2948_v34  ;;  %v531_v19 = vor.u32 %v530_v42, %v2957_v9  ;;  %v534_v23 = vshll.u32 %v208_v55, 16 }
  0x59   : > { %v513_v30 = vsel %vm2730_vm4, %v508_v10, %v512_v49  ;;  %2314 = vmatprep.mubr.msk.bf16.mxu0 %vm666_vm1, %v3005_v46  ;;  %v2039_v11 = vcombine.low %v2998_v1, %v3001_v13  ;;  %v574_v27 = vrot.slane %v572_v63, 5  ;;  %v578_v37 = vrot.slane %v576_v57, 4  ;;  %v214_v57 = vld [vmem:[%s2670_s7 + $0xb0] sm:$0x1] }
  0x5a   : > { %v3019_v38 = vcombine.low %v503_v5, %v513_v30  ;;  %v522_v21 = vrot.slane %v521_v62, 4  ;;  %v589_v3 = vrot.slane %v587_v61, 4  ;;  %v592_v34 = vrot.slane %v590_v41, 5 }
  0x5b   : > { %v532_v50 = vrot.slane %v531_v19, 4  ;;  %v536_v47 = vrot.slane %v534_v23, 5  ;;  %v598_v42 = vrot.slane %v596_v56, 5  ;;  %v602_v55 = vrot.slane %v600_v18, 4  ;;  %v217_v56 = vld [vmem:[%s2670_s7 + $0xbc] sm:$0x1] }
  0x5c   : > { %2239 = vmatmul.mubr.msk.bf16.gmra.mrb[20].mxu1 %vm666_vm1, %v3019_v38  ;;  %v527_v24 = vsel %vm2730_vm4, %v522_v21, %v2957_v9  ;;  %v545_v63 = vor.u32 %v544_v53, %v541_v45  ;;  %v555_v10 = vor.u32 %v554_v39, %v2978_v32  ;;  %v558_v41 = vshll.u32 %v211_v51, 16 }
  0x5d   : > { %v537_v6 = vsel %vm2730_vm4, %v532_v50, %v536_v47  ;;  %2315 = vmatmul.mubr.msk.bf16.gmra.mrb[28].mxu0 %vm666_vm1, %v2039_v11  ;;  %v569_v5 = vor.u32 %v568_v2, %v565_v54  ;;  %v579_v62 = vor.u32 %v578_v37, %v574_v27  ;;  %v582_v9 = vshll.u32 %v214_v57, 16 }
  0x5e   : > { %v1983_v49 = vcombine.low %v527_v24, %v537_v6  ;;  %v546_v61 = vrot.slane %v545_v63, 4  ;;  %2320 = vmatprep.mubr.msk.bf16.mxu0 %vm666_vm1, %v2770_v35  ;;  %v556_v18 = vrot.slane %v555_v10, 4  ;;  %v593_v45 = vor.u32 %v592_v34, %v589_v3 }
  0x5f   : > { %v560_v30 = vrot.slane %v558_v41, 5  ;;  %v570_v39 = vrot.slane %v569_v5, 4  ;;  %v603_v19 = vor.u32 %v602_v55, %v598_v42  ;;  %v580_v23 = vrot.slane %v579_v62, 4 }
  0x60   : > { %2242 = vmatprep.mubr.msk.bf16.mxu1 %vm666_vm1, %v1983_v49  ;;  %v551_v53 = vsel %vm2730_vm4, %v546_v61, %v2978_v32  ;;  %v584_v11 = vrot.slane %v582_v9, 5  ;;  %v606_v21 = vshll.u32 %v217_v56, 16  ;;  %v594_v2 = vrot.slane %v593_v45, 4 }
  0x61   : > { %v561_v35 = vsel %vm2730_vm4, %v556_v18, %v560_v30  ;;  %v575_v54 = vsel %vm2730_vm4, %v570_v39, %v574_v27  ;;  %v604_v37 = vrot.slane %v603_v19, 4  ;;  %v2004_v55 = vcombine.low %v2696_v26, %v2704_v31 }
  0x62   : > { %v1984_v3 = vcombine.low %v551_v53, %v561_v35  ;;  %v585_v34 = vsel %vm2730_vm4, %v580_v23, %v584_v11  ;;  %v608_v50 = vrot.slane %v606_v21, 5  ;;  %v599_v47 = vsel %vm2730_vm4, %v594_v2, %v598_v42 }
  0x63   : > { %v1985_v32 = vcombine.low %v575_v54, %v585_v34  ;;  %v1399_v26 = vshll.u32 %v3001_v13, 16  ;;  %v1403_v31 = vshrl.u32 %v3001_v13, 16 }
  0x64   : > { %2243 = vmatmul.mubr.msk.bf16.gmra.mrb[24].mxu1 %vm666_vm1, %v1984_v3  ;;  %v609_v27 = vsel %vm2730_vm4, %v604_v37, %v608_v50 }
  0x65   : > { %2321 = vmatmul.mubr.msk.bf16.vlgmr.msra.gmra.mrb[0].mxu0 %vm666_vm1, %v2798_v59  ;;  %2246 = vmatprep.mubr.msk.bf16.mxu1 %vm666_vm1, %v1985_v32  ;;  %v1986_v51 = vcombine.low %v599_v47, %v609_v27  ;;  %v1405_v59 = vrot.slane %v1403_v31, 4 }
  0x66   : > { %2324 = vmatprep.mubr.msk.bf16.mxu0 %vm666_vm1, %v2824_v20  ;;  %v220_v20 = vld [vmem:[%s2670_s7 + $0xc8] sm:$0x1] }
  0x6c   : > { %2247 = vmatmul.mubr.msk.bf16.gmra.mrb[28].mxu1 %vm666_vm1, %v1986_v51 }
  0x6d   : > { %2325 = vmatmul.mubr.msk.bf16.gmra.mrb[4].mxu0 %vm666_vm1, %v2846_v48  ;;  %2252 = vmatprep.mubr.msk.bf16.mxu1 %vm666_vm1, %v2004_v55 }
  0x6e   : > { %2328 = vmatprep.mubr.msk.bf16.mxu0 %vm666_vm1, %v2873_v16  ;;  %v1409_v16 = vshll.u32 %v220_v20, 16 }
  0x74   : > { %2253 = vmatmul.mubr.msk.bf16.vlgmr.msra.gmra.mrb[0].mxu1 %vm666_vm1, %v2685_v14  ;;  %v1390_v14 = vshrl.u32 %v2998_v1, 16 }
  0x75   : > { %2329 = vmatmul.mubr.msk.bf16.gmra.mrb[8].mxu0 %vm666_vm1, %v2896_v44  ;;  %2256 = vmatprep.mubr.msk.bf16.mxu1 %vm666_vm1, %v2693_v25  ;;  %v1393_v25 = vshll.u32 %v2998_v1, 16 }
  0x76   : > { %2332 = vmatprep.mubr.msk.bf16.mxu0 %vm666_vm1, %v2923_v15 }
  0x7c   : > { %2257 = vmatmul.mubr.msk.bf16.gmra.mrb[4].mxu1 %vm666_vm1, %v2713_v36  ;;  %v1392_v36 = vrot.slane %v1390_v14, 4 }
  0x7d   : > { %2333 = vmatmul.mubr.msk.bf16.gmra.mrb[12].mxu0 %vm666_vm1, %v2946_v8  ;;  %2260 = vmatprep.mubr.msk.bf16.mxu1 %vm666_vm1, %v2734_v0  ;;  %v1395_v0 = vrot.slane %v1393_v25, 5  ;;  %v1411_v8 = vrot.slane %v1409_v16, 5 }
  0x7e   : > { %2336 = vmatprep.mubr.msk.bf16.mxu0 %vm666_vm1, %v2973_v4 }
  0x7f   : > { %v1396_v48 = vor.u32 %v1395_v0, %v1392_v36 }
  0x81   : > { %v1397_v44 = vrot.slane %v1396_v48, 4 }
  0x84   : > { %2261 = vmatmul.mubr.msk.bf16.gmra.mrb[8].mxu1 %vm666_vm1, %v2751_v17  ;;  %v1401_v17 = vrot.slane %v1399_v26, 5 }
  0x85   : > { %2337 = vmatmul.mubr.msk.bf16.gmra.mrb[16].mxu0 %vm666_vm1, %v2993_v43  ;;  %2264 = vmatprep.mubr.msk.bf16.mxu1 %vm666_vm1, %v2781_v29 }
  0x86   : > { %2340 = vmatprep.mubr.msk.bf16.mxu0 %vm666_vm1, %v3019_v38  ;;  %v1406_v29 = vor.u32 %v1405_v59, %v1401_v17 }
  0x88   : > { %v1407_v15 = vrot.slane %v1406_v29, 4 }
  0x8c   : > { %2265 = vmatmul.mubr.msk.bf16.gmra.mrb[12].mxu1 %vm666_vm1, %v2807_v7  ;;  %v1402_v7 = vsel %vm2730_vm4, %v1397_v44, %v1401_v17 }
  0x8d   : > { %2341 = vmatmul.mubr.msk.bf16.gmra.mrb[20].mxu0 %vm666_vm1, %v1983_v49  ;;  %2268 = vmatprep.mubr.msk.bf16.mxu1 %vm666_vm1, %v2836_v40  ;;  %v1412_v40 = vsel %vm2730_vm4, %v1407_v15, %v1411_v8 }
  0x8e   : > { %2344 = vmatprep.mubr.msk.bf16.mxu0 %vm666_vm1, %v1984_v3  ;;  %v2059_v4 = vcombine.low %v1402_v7, %v1412_v40 }
  0x94   : > { %2269 = vmatmul.mubr.msk.bf16.gmra.mrb[16].mxu1 %vm666_vm1, %v2859_v58 }
  0x95   : > { %2345 = vmatmul.mubr.msk.bf16.gmra.mrb[24].mxu0 %vm666_vm1, %v1985_v32  ;;  %2272 = vmatprep.mubr.msk.bf16.mxu1 %vm666_vm1, %v2885_v28 }
  0x96   : > { %2348 = vmatprep.mubr.msk.bf16.mxu0 %vm666_vm1, %v1986_v51 }
  0x9c   : > { %2273 = vmatmul.mubr.msk.bf16.gmra.mrb[20].mxu1 %vm666_vm1, %v2909_v52 }
  0x9d   : > { %2349 = vmatmul.mubr.msk.bf16.gmra.mrb[28].mxu0 %vm666_vm1, %v2059_v4  ;;  %2276 = vmatprep.mubr.msk.bf16.mxu1 %vm666_vm1, %v2935_v12  ;;  %v3122_v12 = vld [vmem:[%s3336_s2] ss:$0 sm:$0xff] }
  0xa4   : > { %2277 = vmatmul.mubr.msk.bf16.gmra.mrb[24].mxu1 %vm666_vm1, %v2959_v33 }
  0xa5   : > { %2280 = vmatprep.mubr.msk.bf16.mxu1 %vm666_vm1, %v2983_v22 }
  0xac   : > { %2281 = vmatmul.mubr.msk.bf16.gmra.mrb[28].mxu1 %vm666_vm1, %v3005_v46 }
 0x138   : > { %v2322_v60 = vpop.f32.mrb[0].mxu0 }
 0x139   : > { %v1464_v58 = vpop.f32.mrb[1].mxu0 }
 0x13a   : > { %v2323_v28 = vpop.f32.mrb[2].mxu0 }
 0x13b   : > { %v1467_v43 = vpop.f32.mrb[3].mxu0 }
 0x140   : > { %v2326_v52 = vpop.f32.mrb[4].mxu0 }
 0x141   : > { %v1480_v1 = vpop.f32.mrb[5].mxu0 }
 0x142   : > { %v2327_v13 = vpop.f32.mrb[6].mxu0 }
 0x143   : > { %v1483_v38 = vpop.f32.mrb[7].mxu0 }
 0x147   : > { %v2254_v42 = vpop.f32.mrb[0].mxu1 }
 0x148   : > { %v2330_v33 = vpop.f32.mrb[8].mxu0  ;;  %v2352_v22 = vadd.f32 %v2322_v60, %v2254_v42  ;;  %v1050_v24 = vpop.f32.mrb[1].mxu1 }
 0x149   : > { %v3124_v63 = vpop.f32.mrb[9].mxu0  ;;  %v2353_v46 = vadd.f32 %v1464_v58, %v1050_v24  ;;  %v2255_v57 = vpop.f32.mrb[2].mxu1 }
 0x14a   : > { %v3127_v6 = vpop.f32.mrb[10].mxu0  ;;  %v1632_v10 = vadd.f32 %v2352_v22, %v3122_v12  ;;  %v2354_v49 = vadd.f32 %v2323_v28, %v2255_v57  ;;  %v1053_v61 = vpop.f32.mrb[3].mxu1 }
 0x14b   : > { %v3130_v41 = vpop.f32.mrb[11].mxu0  ;;  %v1630_v5 = vadd.f32 %v2353_v46, %v3122_v12  ;;  %v2355_v56 = vadd.f32 %v1467_v43, %v1053_v61 }
 0x14c   : > { %v1664_v18 = vmax.f32 %v1632_v10, 0.0  ;;  %v1633_v62 = vadd.f32 %v2354_v49, %v3122_v12 }
 0x14d   : > { %v1662_v9 = vmax.f32 %v1630_v5, 0.0  ;;  %v1631_v45 = vadd.f32 %v2355_v56, %v3122_v12 }
 0x14e   : > { %v1696_v53 = vmin.f32 %v1664_v18, 6.0  ;;  %v1665_v30 = vmax.f32 %v1633_v62, 0.0 }
 0x14f   : > { %v1694_v39 = vmin.f32 %v1662_v9, 6.0  ;;  %v1663_v19 = vmax.f32 %v1631_v45, 0.0  ;;  %v2258_v23 = vpop.f32.mrb[4].mxu1 }
 0x150   : > { %v3137_v11 = vpop.f32.mrb[12].mxu0  ;;  %v2117_v21 = vpack.c.bf16 %v1696_v53, %v1696_v53  ;;  %v1697_v35 = vmin.f32 %v1665_v30, 6.0  ;;  %v2356_v54 = vadd.f32 %v2326_v52, %v2258_v23  ;;  %v1066_v2 = vpop.f32.mrb[5].mxu1 }
 0x151   : > { %v3139_v37 = vpop.f32.mrb[13].mxu0  ;;  %v2115_v3 = vpack.c.bf16 %v1694_v39, %v1694_v39  ;;  %v1695_v34 = vmin.f32 %v1663_v19, 6.0  ;;  %v2357_v50 = vadd.f32 %v1480_v1, %v1066_v2  ;;  %v2259_v32 = vpop.f32.mrb[6].mxu1 }
 0x152   : > { %v3141_v47 = vpop.f32.mrb[14].mxu0  ;;  %1857 = vst.msk [vmem:[%s3143_s20 + $0x8] sm:$0xf] %vm1854_vm5, %v2117_v21  ;;  %v2118_v27 = vpack.c.bf16 %v1697_v35, %v1697_v35  ;;  %v1636_v51 = vadd.f32 %v2356_v54, %v3122_v12  ;;  %v2358_v55 = vadd.f32 %v2327_v13, %v2259_v32  ;;  %v1069_v14 = vpop.f32.mrb[7].mxu1 }
 0x153   : > { %v3148_v25 = vpop.f32.mrb[15].mxu0  ;;  %1855 = vst.msk [vmem:[%s3143_s20] sm:$0xf] %vm1854_vm5, %v2115_v3  ;;  %v2116_v26 = vpack.c.bf16 %v1695_v34, %v1695_v34  ;;  %v1634_v31 = vadd.f32 %v2357_v50, %v3122_v12  ;;  %v2359_v36 = vadd.f32 %v1483_v38, %v1069_v14 }
 0x154   : > { %1858 = vst.msk [vmem:[%s3143_s20 + $0xc] sm:$0xf] %vm1854_vm5, %v2118_v27  ;;  %v1668_v0 = vmax.f32 %v1636_v51, 0.0  ;;  %v1637_v17 = vadd.f32 %v2358_v55, %v3122_v12 }
 0x155   : > { %1856 = vst.msk [vmem:[%s3143_s20 + $0x4] sm:$0xf] %vm1854_vm5, %v2116_v26  ;;  %v1666_v59 = vmax.f32 %v1634_v31, 0.0  ;;  %v1635_v20 = vadd.f32 %v2359_v36, %v3122_v12 }
 0x156   : > { %v1700_v48 = vmin.f32 %v1668_v0, 6.0  ;;  %v1669_v29 = vmax.f32 %v1637_v17, 0.0 }
 0x157   : > { %v1698_v16 = vmin.f32 %v1666_v59, 6.0  ;;  %v1667_v44 = vmax.f32 %v1635_v20, 0.0  ;;  %v2262_v15 = vpop.f32.mrb[8].mxu1 }
 0x158   : > { %v3159_v8 = vpop.f32.mrb[16].mxu0  ;;  %v2121_v7 = vpack.c.bf16 %v1700_v48, %v1700_v48  ;;  %v1701_v40 = vmin.f32 %v1669_v29, 6.0  ;;  %v2360_v4 = vadd.f32 %v2330_v33, %v2262_v15  ;;  %v1082_v60 = vpop.f32.mrb[9].mxu1 }
 0x159   : > { %v3161_v58 = vpop.f32.mrb[17].mxu0  ;;  %v2119_v28 = vpack.c.bf16 %v1698_v16, %v1698_v16  ;;  %v1699_v43 = vmin.f32 %v1667_v44, 6.0  ;;  %v2361_v52 = vadd.f32 %v3124_v63, %v1082_v60  ;;  %v2263_v1 = vpop.f32.mrb[10].mxu1 }
 0x15a   : > { %v3164_v13 = vpop.f32.mrb[18].mxu0  ;;  %1861 = vst.msk [vmem:[%s3143_s20 + $0x18] sm:$0xf] %vm1854_vm5, %v2121_v7  ;;  %v2122_v38 = vpack.c.bf16 %v1701_v40, %v1701_v40  ;;  %v1640_v42 = vadd.f32 %v2360_v4, %v3122_v12  ;;  %v2362_v22 = vadd.f32 %v3127_v6, %v2263_v1  ;;  %v1085_v33 = vpop.f32.mrb[11].mxu1 }
 0x15b   : > { %v3170_v24 = vpop.f32.mrb[19].mxu0  ;;  %1859 = vst.msk [vmem:[%s3143_s20 + $0x10] sm:$0xf] %vm1854_vm5, %v2119_v28  ;;  %v2120_v46 = vpack.c.bf16 %v1699_v43, %v1699_v43  ;;  %v1638_v57 = vadd.f32 %v2361_v52, %v3122_v12  ;;  %v2363_v63 = vadd.f32 %v3130_v41, %v1085_v33 }
 0x15c   : > { %1862 = vst.msk [vmem:[%s3143_s20 + $0x1c] sm:$0xf] %vm1854_vm5, %v2122_v38  ;;  %v1672_v10 = vmax.f32 %v1640_v42, 0.0  ;;  %v1641_v49 = vadd.f32 %v2362_v22, %v3122_v12 }
 0x15d   : > { %1860 = vst.msk [vmem:[%s3143_s20 + $0x14] sm:$0xf] %vm1854_vm5, %v2120_v46  ;;  %v1670_v61 = vmax.f32 %v1638_v57, 0.0  ;;  %v1639_v6 = vadd.f32 %v2363_v63, %v3122_v12 }
 0x15e   : > { %v1704_v5 = vmin.f32 %v1672_v10, 6.0  ;;  %v1673_v56 = vmax.f32 %v1641_v49, 0.0 }
 0x15f   : > { %v1702_v18 = vmin.f32 %v1670_v61, 6.0  ;;  %v1671_v62 = vmax.f32 %v1639_v6, 0.0  ;;  %v2266_v9 = vpop.f32.mrb[12].mxu1 }
 0x160   : > { %v3182_v45 = vpop.f32.mrb[20].mxu0  ;;  %v2125_v53 = vpack.c.bf16 %v1704_v5, %v1704_v5  ;;  %v1705_v41 = vmin.f32 %v1673_v56, 6.0  ;;  %v2364_v30 = vadd.f32 %v3137_v11, %v2266_v9  ;;  %v1098_v39 = vpop.f32.mrb[13].mxu1 }
 0x161   : > { %v3185_v19 = vpop.f32.mrb[21].mxu0  ;;  %v2123_v23 = vpack.c.bf16 %v1702_v18, %v1702_v18  ;;  %v1703_v21 = vmin.f32 %v1671_v62, 6.0  ;;  %v2365_v35 = vadd.f32 %v3139_v37, %v1098_v39  ;;  %v2267_v54 = vpop.f32.mrb[14].mxu1 }
 0x162   : > { %v3188_v2 = vpop.f32.mrb[22].mxu0  ;;  %1865 = vst.msk [vmem:[%s3143_s20 + $0x28] sm:$0xf] %vm1854_vm5, %v2125_v53  ;;  %v2126_v3 = vpack.c.bf16 %v1705_v41, %v1705_v41  ;;  %v1644_v34 = vadd.f32 %v2364_v30, %v3122_v12  ;;  %v2366_v50 = vadd.f32 %v3141_v47, %v2267_v54  ;;  %v1101_v11 = vpop.f32.mrb[15].mxu1 }
 0x163   : > { %v3194_v32 = vpop.f32.mrb[23].mxu0  ;;  %1863 = vst.msk [vmem:[%s3143_s20 + $0x20] sm:$0xf] %vm1854_vm5, %v2123_v23  ;;  %v2124_v27 = vpack.c.bf16 %v1703_v21, %v1703_v21  ;;  %v1642_v51 = vadd.f32 %v2365_v35, %v3122_v12  ;;  %v2367_v37 = vadd.f32 %v3148_v25, %v1101_v11 }
 0x164   : > { %1866 = vst.msk [vmem:[%s3143_s20 + $0x2c] sm:$0xf] %vm1854_vm5, %v2126_v3  ;;  %v1676_v55 = vmax.f32 %v1644_v34, 0.0  ;;  %v1645_v14 = vadd.f32 %v2366_v50, %v3122_v12 }
 0x165   : > { %1864 = vst.msk [vmem:[%s3143_s20 + $0x24] sm:$0xf] %vm1854_vm5, %v2124_v27  ;;  %v1674_v26 = vmax.f32 %v1642_v51, 0.0  ;;  %v1643_v47 = vadd.f32 %v2367_v37, %v3122_v12 }
 0x166   : > { %v1708_v31 = vmin.f32 %v1676_v55, 6.0  ;;  %v1677_v36 = vmax.f32 %v1645_v14, 0.0 }
 0x167   : > { %v1706_v0 = vmin.f32 %v1674_v26, 6.0  ;;  %v1675_v17 = vmax.f32 %v1643_v47, 0.0  ;;  %v2270_v59 = vpop.f32.mrb[16].mxu1 }
 0x168   : > { %v3206_v20 = vpop.f32.mrb[24].mxu0  ;;  %v2129_v48 = vpack.c.bf16 %v1708_v31, %v1708_v31  ;;  %v1709_v25 = vmin.f32 %v1677_v36, 6.0  ;;  %v2368_v29 = vadd.f32 %v3159_v8, %v2270_v59  ;;  %v1114_v16 = vpop.f32.mrb[17].mxu1 }
 0x169   : > { %v3209_v44 = vpop.f32.mrb[25].mxu0  ;;  %v2127_v15 = vpack.c.bf16 %v1706_v0, %v1706_v0  ;;  %v1707_v7 = vmin.f32 %v1675_v17, 6.0  ;;  %v2369_v40 = vadd.f32 %v3161_v58, %v1114_v16  ;;  %v2271_v4 = vpop.f32.mrb[18].mxu1 }
 0x16a   : > { %v3212_v60 = vpop.f32.mrb[26].mxu0  ;;  %1869 = vst.msk [vmem:[%s3143_s20 + $0x38] sm:$0xf] %vm1854_vm5, %v2129_v48  ;;  %v2130_v28 = vpack.c.bf16 %v1709_v25, %v1709_v25  ;;  %v1648_v43 = vadd.f32 %v2368_v29, %v3122_v12  ;;  %v2370_v52 = vadd.f32 %v3164_v13, %v2271_v4  ;;  %v1117_v8 = vpop.f32.mrb[19].mxu1 }
 0x16b   : > { %v3218_v1 = vpop.f32.mrb[27].mxu0  ;;  %1867 = vst.msk [vmem:[%s3143_s20 + $0x30] sm:$0xf] %vm1854_vm5, %v2127_v15  ;;  %v2128_v38 = vpack.c.bf16 %v1707_v7, %v1707_v7  ;;  %v1646_v42 = vadd.f32 %v2369_v40, %v3122_v12  ;;  %v2371_v58 = vadd.f32 %v3170_v24, %v1117_v8 }
 0x16c   : > { %1870 = vst.msk [vmem:[%s3143_s20 + $0x3c] sm:$0xf] %vm1854_vm5, %v2130_v28  ;;  %v1680_v22 = vmax.f32 %v1648_v43, 0.0  ;;  %v1649_v33 = vadd.f32 %v2370_v52, %v3122_v12 }
 0x16d   : > { %1868 = vst.msk [vmem:[%s3143_s20 + $0x34] sm:$0xf] %vm1854_vm5, %v2128_v38  ;;  %v1678_v46 = vmax.f32 %v1646_v42, 0.0  ;;  %v1647_v13 = vadd.f32 %v2371_v58, %v3122_v12 }
 0x16e   : > { %v1712_v57 = vmin.f32 %v1680_v22, 6.0  ;;  %v1681_v63 = vmax.f32 %v1649_v33, 0.0 }
 0x16f   : > { %v1710_v10 = vmin.f32 %v1678_v46, 6.0  ;;  %v1679_v49 = vmax.f32 %v1647_v13, 0.0  ;;  %v2274_v61 = vpop.f32.mrb[20].mxu1 }
 0x170   : > { %v2350_v6 = vpop.f32.mrb[28].mxu0  ;;  %v2133_v5 = vpack.c.bf16 %v1712_v57, %v1712_v57  ;;  %v1713_v24 = vmin.f32 %v1681_v63, 6.0  ;;  %v2372_v56 = vadd.f32 %v3182_v45, %v2274_v61  ;;  %v1130_v18 = vpop.f32.mrb[21].mxu1 }
 0x171   : > { %v1576_v62 = vpop.f32.mrb[29].mxu0  ;;  %v2131_v9 = vpack.c.bf16 %v1710_v10, %v1710_v10  ;;  %v1711_v53 = vmin.f32 %v1679_v49, 6.0  ;;  %v2373_v41 = vadd.f32 %v3185_v19, %v1130_v18  ;;  %v2275_v30 = vpop.f32.mrb[22].mxu1 }
 0x172   : > { %v2351_v39 = vpop.f32.mrb[30].mxu0  ;;  %1873 = vst.msk [vmem:[%s3143_s20 + $0x48] sm:$0xf] %vm1854_vm5, %v2133_v5  ;;  %v2134_v23 = vpack.c.bf16 %v1713_v24, %v1713_v24  ;;  %v1652_v21 = vadd.f32 %v2372_v56, %v3122_v12  ;;  %v2374_v35 = vadd.f32 %v3188_v2, %v2275_v30  ;;  %v1133_v54 = vpop.f32.mrb[23].mxu1 }
 0x173   : > { %v1579_v3 = vpop.f32.mrb[31].mxu0  ;;  %1871 = vst.msk [vmem:[%s3143_s20 + $0x40] sm:$0xf] %vm1854_vm5, %v2131_v9  ;;  %v2132_v45 = vpack.c.bf16 %v1711_v53, %v1711_v53  ;;  %v1650_v34 = vadd.f32 %v2373_v41, %v3122_v12  ;;  %v2375_v50 = vadd.f32 %v3194_v32, %v1133_v54 }
 0x174   : > { %1874 = vst.msk [vmem:[%s3143_s20 + $0x4c] sm:$0xf] %vm1854_vm5, %v2134_v23  ;;  %v1684_v19 = vmax.f32 %v1652_v21, 0.0  ;;  %v1653_v11 = vadd.f32 %v2374_v35, %v3122_v12 }
 0x175   : > { %1872 = vst.msk [vmem:[%s3143_s20 + $0x44] sm:$0xf] %vm1854_vm5, %v2132_v45  ;;  %v1682_v27 = vmax.f32 %v1650_v34, 0.0  ;;  %v1651_v2 = vadd.f32 %v2375_v50, %v3122_v12 }
 0x176   : > { %v1716_v51 = vmin.f32 %v1684_v19, 6.0  ;;  %v1685_v37 = vmax.f32 %v1653_v11, 0.0 }
 0x177   : > { %v1714_v55 = vmin.f32 %v1682_v27, 6.0  ;;  %v1683_v14 = vmax.f32 %v1651_v2, 0.0  ;;  %v2278_v26 = vpop.f32.mrb[24].mxu1 }
 0x178   : > { %v2137_v47 = vpack.c.bf16 %v1716_v51, %v1716_v51  ;;  %v1717_v31 = vmin.f32 %v1685_v37, 6.0  ;;  %v2376_v32 = vadd.f32 %v3206_v20, %v2278_v26  ;;  %v1146_v36 = vpop.f32.mrb[25].mxu1 }
 0x179   : > { %v2135_v0 = vpack.c.bf16 %v1714_v55, %v1714_v55  ;;  %v1715_v17 = vmin.f32 %v1683_v14, 6.0  ;;  %v2377_v59 = vadd.f32 %v3209_v44, %v1146_v36  ;;  %v2279_v48 = vpop.f32.mrb[26].mxu1 }
 0x17a   : > { %1877 = vst.msk [vmem:[%s3143_s20 + $0x58] sm:$0xf] %vm1854_vm5, %v2137_v47  ;;  %v2138_v25 = vpack.c.bf16 %v1717_v31, %v1717_v31  ;;  %v1656_v29 = vadd.f32 %v2376_v32, %v3122_v12  ;;  %v2378_v16 = vadd.f32 %v3212_v60, %v2279_v48  ;;  %v1149_v15 = vpop.f32.mrb[27].mxu1 }
 0x17b   : > { %1875 = vst.msk [vmem:[%s3143_s20 + $0x50] sm:$0xf] %vm1854_vm5, %v2135_v0  ;;  %v2136_v7 = vpack.c.bf16 %v1715_v17, %v1715_v17  ;;  %v1654_v20 = vadd.f32 %v2377_v59, %v3122_v12  ;;  %v2379_v40 = vadd.f32 %v3218_v1, %v1149_v15 }
 0x17c   : > { %1878 = vst.msk [vmem:[%s3143_s20 + $0x5c] sm:$0xf] %vm1854_vm5, %v2138_v25  ;;  %v1688_v4 = vmax.f32 %v1656_v29, 0.0  ;;  %v1657_v44 = vadd.f32 %v2378_v16, %v3122_v12 }
 0x17d   : > { %1876 = vst.msk [vmem:[%s3143_s20 + $0x54] sm:$0xf] %vm1854_vm5, %v2136_v7  ;;  %v1686_v28 = vmax.f32 %v1654_v20, 0.0  ;;  %v1655_v43 = vadd.f32 %v2379_v40, %v3122_v12 }
 0x17e   : > { %v1720_v60 = vmin.f32 %v1688_v4, 6.0  ;;  %v1689_v52 = vmax.f32 %v1657_v44, 0.0 }
 0x17f   : > { %v1718_v8 = vmin.f32 %v1686_v28, 6.0  ;;  %v1687_v38 = vmax.f32 %v1655_v43, 0.0  ;;  %v2282_v42 = vpop.f32.mrb[28].mxu1 }
 0x180   : > { %v2141_v58 = vpack.c.bf16 %v1720_v60, %v1720_v60  ;;  %v1721_v22 = vmin.f32 %v1689_v52, 6.0  ;;  %v2380_v1 = vadd.f32 %v2350_v6, %v2282_v42  ;;  %v1162_v33 = vpop.f32.mrb[29].mxu1 }
 0x181   : > { %v2139_v46 = vpack.c.bf16 %v1718_v8, %v1718_v8  ;;  %v1719_v13 = vmin.f32 %v1687_v38, 6.0  ;;  %v2381_v57 = vadd.f32 %v1576_v62, %v1162_v33  ;;  %v2283_v63 = vpop.f32.mrb[30].mxu1 }
 0x182   : > { %1881 = vst.msk [vmem:[%s3143_s20 + $0x68] sm:$0xf] %vm1854_vm5, %v2141_v58  ;;  %v2142_v10 = vpack.c.bf16 %v1721_v22, %v1721_v22  ;;  %v1660_v49 = vadd.f32 %v2380_v1, %v3122_v12  ;;  %v2382_v61 = vadd.f32 %v2351_v39, %v2283_v63  ;;  %v1165_v5 = vpop.f32.mrb[31].mxu1 }
 0x183   : > { %1879 = vst.msk [vmem:[%s3143_s20 + $0x60] sm:$0xf] %vm1854_vm5, %v2139_v46  ;;  %v2140_v24 = vpack.c.bf16 %v1719_v13, %v1719_v13  ;;  %v1658_v6 = vadd.f32 %v2381_v57, %v3122_v12  ;;  %v2383_v56 = vadd.f32 %v1579_v3, %v1165_v5 }
 0x184   : > { %1882 = vst.msk [vmem:[%s3143_s20 + $0x6c] sm:$0xf] %vm1854_vm5, %v2142_v10  ;;  %v1692_v18 = vmax.f32 %v1660_v49, 0.0  ;;  %v1661_v62 = vadd.f32 %v2382_v61, %v3122_v12 }
 0x185   : > { %1880 = vst.msk [vmem:[%s3143_s20 + $0x64] sm:$0xf] %vm1854_vm5, %v2140_v24  ;;  %v1690_v9 = vmax.f32 %v1658_v6, 0.0  ;;  %v1659_v53 = vadd.f32 %v2383_v56, %v3122_v12 }
 0x186   : > { %v1724_v41 = vmin.f32 %v1692_v18, 6.0  ;;  %v1693_v30 = vmax.f32 %v1661_v62, 0.0 }
 0x187   : > { %v1722_v39 = vmin.f32 %v1690_v9, 6.0  ;;  %v1691_v23 = vmax.f32 %v1659_v53, 0.0 }
 0x188   : > { %v2145_v21 = vpack.c.bf16 %v1724_v41, %v1724_v41  ;;  %v1725_v35 = vmin.f32 %v1693_v30, 6.0 }
 0x189   : > { %v2143_v54 = vpack.c.bf16 %v1722_v39, %v1722_v39  ;;  %v1723_v3 = vmin.f32 %v1691_v23, 6.0 }
 0x18a   : > { %1885 = vst.msk [vmem:[%s3143_s20 + $0x78] sm:$0xf] %vm1854_vm5, %v2145_v21  ;;  %v2146_v45 = vpack.c.bf16 %v1725_v35, %v1725_v35 }
 0x18b   : > { %1883 = vst.msk [vmem:[%s3143_s20 + $0x70] sm:$0xf] %vm1854_vm5, %v2143_v54  ;;  %v2144_v12 = vpack.c.bf16 %v1723_v3, %v1723_v3 }
 0x18c   : > { %1886 = vst.msk [vmem:[%s3143_s20 + $0x7c] sm:$0xf] %vm1854_vm5, %v2146_v45 }
 0x18d   : > { %1884 = vst.msk [vmem:[%s3143_s20 + $0x74] sm:$0xf] %vm1854_vm5, %v2144_v12 }
 0x18e   : > { %2528 = shalt.err (!%p2525_p3)
}
 0x18f   : > { %s2529_s6 = scalar_lea.hbm %s3281_s28, 2048  ;;  %s2533_s9 = scalar_lea.hbm %s3337_s3, 4096 }
 0x190   : > { %p2530_p4 = scmp.ne.s32.totalorder %s3281_s28, %s2529_s6  ;;  %p2534_p9 = scmp.lt.u32.totalorder %s3281_s28, %s3337_s3 }
 0x191   : > { %p2535_p10 = scmp.lt.u32.totalorder %s2533_s9, %s2529_s6  ;;  %p2537_p12 = scmp.lt.u32.totalorder %s2529_s6, %s3281_s28 }
 0x192   : > { %p2531_p7 = pnand %p2530_p4, %p2640_p5 }
 0x193   : > { %p2536_p11 = por %p2535_p10, %p2534_p9 }
 0x194   : > { %p2532_p8 = pneg %p2531_p7 }
 0x195   : > { %p2538_p13 = por %p2537_p12, %p2536_p11 }
 0x197   : > { %p2539_p0 = pnand %p2538_p13, %p2532_p8 }
 0x199   : > { %2542 = shalt.err (!%p2539_p0)
}
 0x19a   : > { %s2580_s17 = smov 64   ;;  %s2581_s19 = smov 4  }
 0x19b   : > { %2453 = dma.vmem_to_hbm [thread:$0]  (%p2640_p5), %s3283_s25, 2048, %s3281_s28, %s3293_s16, %s2580_s17, %s2580_s17, %s2581_s19  }
 0x19c PF: > { %p2459_p1 = scmp.ge.s32.totalorder %s2577_s15, 2  ;;  %s1916_s20 = sand.u32 1, %s2565_s12  }
 0x19d   : > { %s1917_s24 = scalar_lea.sflag [#allocation3], %s1916_s20 }
 0x19e   : > { %p2456_p2 = pnand %p2459_p1, %p2644_p6 }
 0x1a0   : > { %2560 = dma.done.wait (!%p2456_p2), %s1917_s24, 2048  }
 0x1a1   : > { %2562 = vsyncadd (!%p2456_p2), %s1917_s24, 4294965248  ;;  %p13_p3 = scmp.ge.s32.totalorder %s2627_s18, 4   ;;  %s3342_s12 = smov %s2569_s13 }
 0x1a2   : > { %s3343_s13 = smov %s2573_s14  ;;  %s3344_s14 = smov %s2638_s21 }
 0x1a3   : > { %s3345_s15 = smov %s2627_s18  ;;  %15 = sbr.rel (!%p13_p3) target bundleno = 3 (0x3), region = 70 }
 0x1aa   :  { %1922 = vsyncpa [#allocation3], 1 }
 0x1ab   :  { %1924 = vsyncpa [#allocation3 + $0x1], 1 }

</bundles_post_ra>
